<compile_context>
chip_gen: v5e
topology: v5e:2x2
jax: 0.10.0
libtpu: 0.0.40
codegen_flags: <defaults>
</compile_context>

<pallas_src>
import jax
import jax.numpy as jnp
from jax.experimental import pallas as pl
from jax.experimental.pallas import tpu as pltpu

BN_EPS = 1e-5
LANE = 128
SUBLANE = 8


def _round_up(x, m):
    return (x + m - 1) // m * m


def _pad2(a, rows, cols):
    return jnp.pad(a, ((0, rows - a.shape[0]), (0, cols - a.shape[1])))


# ---------------------------------------------------------------------------
# Fused forward kernel
# ---------------------------------------------------------------------------
def build_fused_gcn_kernel(n_layers):
    """Build a kernel for the whole GCN forward pass.

    Positional refs:
      src_idx, dst_idx              (2Ep, 1) int32  -- concatenated pos|neg edges
      A[0..L-1]                     (N, N)   f32    -- normalized dense adjacencies
      x                             (N, Fp)  f32    -- zero-padded node features
      W[0..L-1], b[0..L-1]                          -- GraphConv params (padded)
      gamma[0..L-2], beta[0..L-2]                   -- BatchNorm affine (pad = 0)
      pw1, pb1, pw2, pb2, pw3, pb3                  -- predictor MLP (w3/b3 padded)
      o                             (2Ep, 128) f32  -- logits in column 0
    """

    def kernel(*refs):
        i = 0
        src_ref, dst_ref = refs[i], refs[i + 1]; i += 2
        a_refs = refs[i:i + n_layers]; i += n_layers
        x_ref = refs[i]; i += 1
        w_refs = refs[i:i + n_layers]; i += n_layers
        b_refs = refs[i:i + n_layers]; i += n_layers
        g_refs = refs[i:i + n_layers - 1]; i += n_layers - 1
        be_refs = refs[i:i + n_layers - 1]; i += n_layers - 1
        pw1, pb1, pw2, pb2, pw3, pb3 = refs[i:i + 6]; i += 6
        o_ref = refs[i]

        h = x_ref[...]
        for l in range(n_layers):
            # DGL GraphConv(norm='both', bias=True): h = A_norm @ (h @ W) + b
            hw = jnp.dot(h, w_refs[l][...], preferred_element_type=jnp.float32)
            h = jnp.dot(a_refs[l][...], hw, preferred_element_type=jnp.float32)
            h = h + b_refs[l][...]
            if l != n_layers - 1:
                # BatchNorm1d (training-mode batch stats over nodes) + ReLU,
                # with the affine folded into a single scale/shift.
                mean = jnp.mean(h, axis=0, keepdims=True)
                var = jnp.mean((h - mean) ** 2, axis=0, keepdims=True)
                scale = g_refs[l][...] * jax.lax.rsqrt(var + BN_EPS)
                shift = be_refs[l][...] - mean * scale
                h = jnp.maximum(h * scale + shift, 0.0)
                # TODO(synk): dropout applied as identity (eval mode); training
                # dropout would use pltpu.prng_seed / pltpu.prng_random_bits.

        # In-kernel edge gather: exact one-hot row selection done on the MXU
        # (selector entries are exactly 0.0 / 1.0, so h_src/h_dst are exact).
        e2 = o_ref.shape[0]
        n = h.shape[0]
        col = jax.lax.broadcasted_iota(jnp.int32, (e2, n), 1)
        sel_src = (col == src_ref[...]).astype(jnp.float32)
        sel_dst = (col == dst_ref[...]).astype(jnp.float32)
        h_src = jnp.dot(sel_src, h, preferred_element_type=jnp.float32)
        h_dst = jnp.dot(sel_dst, h, preferred_element_type=jnp.float32)

        # predictor(h_src * h_dst): Linear -> ReLU -> Linear -> ReLU -> Linear(->1)
        z = h_src * h_dst
        z = jnp.maximum(
            jnp.dot(z, pw1[...], preferred_element_type=jnp.float32) + pb1[...], 0.0)
        z = jnp.maximum(
            jnp.dot(z, pw2[...], preferred_element_type=jnp.float32) + pb2[...], 0.0)
        o_ref[...] = jnp.dot(z, pw3[...], preferred_element_type=jnp.float32) + pb3[...]

    return kernel


# ---------------------------------------------------------------------------
# Forward wrapper (padding + single pallas_call + un-padding)
# ---------------------------------------------------------------------------
def gcn_forward(params, blocks, x, pos_edges, neg_edges):
    n_layers = len(params["conv_w"])
    n, in_feats = x.shape
    h_dim = params["conv_w"][0].shape[1]
    fp = _round_up(in_feats, LANE)
    hp = _round_up(h_dim, LANE)

    # Zero-pad all feature/lane dims to multiples of 128.  Padded channels stay
    # exactly zero through conv / BN / ReLU / predictor (gamma,beta,bias pad = 0).
    x_p = _pad2(x, n, fp)
    w_p, b_p = [], []
    for l in range(n_layers):
        rows = fp if l == 0 else hp
        w_p.append(_pad2(params["conv_w"][l], rows, hp))
        b_p.append(_pad2(params["conv_b"][l], 1, hp))
    g_p = [_pad2(g, 1, hp) for g in params["bn_gamma"]]
    be_p = [_pad2(b, 1, hp) for b in params["bn_beta"]]
    pr = params["pred"]
    pw1, pb1 = _pad2(pr["w1"], hp, hp), _pad2(pr["b1"], 1, hp)
    pw2, pb2 = _pad2(pr["w2"], hp, hp), _pad2(pr["b2"], 1, hp)
    # Width-1 logit head padded to a lane-dense 128-wide slab (real logit = col 0).
    pw3, pb3 = _pad2(pr["w3"], hp, LANE), _pad2(pr["b3"], 1, LANE)

    pos_src, pos_dst = pos_edges
    neg_src, neg_dst = neg_edges
    e = int(pos_src.shape[0])
    src_idx = jnp.concatenate([pos_src, neg_src]).astype(jnp.int32).reshape(-1, 1)
    dst_idx = jnp.concatenate([pos_dst, neg_dst]).astype(jnp.int32).reshape(-1, 1)
    e2 = src_idx.shape[0]
    # Pad edge rows to a sublane multiple so the output slab is tile-aligned.
    e2p = _round_up(max(e2, SUBLANE), SUBLANE)
    src_idx = jnp.pad(src_idx, ((0, e2p - e2), (0, 0)))
    dst_idx = jnp.pad(dst_idx, ((0, e2p - e2), (0, 0)))

    inputs = [src_idx, dst_idx, *blocks, x_p, *w_p, *b_p, *g_p, *be_p,
              pw1, pb1, pw2, pb2, pw3, pb3]
    vmem = pl.BlockSpec(memory_space=pltpu.MemorySpace.VMEM)

    out = pl.pallas_call(
        build_fused_gcn_kernel(n_layers),
        out_shape=jax.ShapeDtypeStruct((e2p, LANE), jnp.float32),
        in_specs=[vmem] * len(inputs),
        out_specs=vmem,
        compiler_params=pltpu.CompilerParams(vmem_limit_bytes=64 << 20),
    )(*inputs)

    logits = out[:e2, 0:1]
    return logits[:e], logits[e:]


# ---------------------------------------------------------------------------
# Pure-jnp reference (unpadded) for correctness checking
# ---------------------------------------------------------------------------
def gcn_forward_ref(params, blocks, x, pos_edges, neg_edges):
    def pred(z):
        z = jnp.maximum(z @ params["pred"]["w1"] + params["pred"]["b1"], 0.0)
        z = jnp.maximum(z @ params["pred"]["w2"] + params["pred"]["b2"], 0.0)
        return z @ params["pred"]["w3"] + params["pred"]["b3"]

    n_layers = len(params["conv_w"])
    h = x
    for l in range(n_layers):
        h = blocks[l] @ (h @ params["conv_w"][l]) + params["conv_b"][l]
        if l != n_layers - 1:
            mean = h.mean(axis=0, keepdims=True)
            var = ((h - mean) ** 2).mean(axis=0, keepdims=True)
            h = (h - mean) * jax.lax.rsqrt(var + BN_EPS)
            h = jnp.maximum(h * params["bn_gamma"][l] + params["bn_beta"][l], 0.0)
    ps, pd = pos_edges
    ns, nd = neg_edges
    return pred(h[ps] * h[pd]), pred(h[ns] * h[nd])


# ---------------------------------------------------------------------------
# Deterministic parameter / input construction
# ---------------------------------------------------------------------------
def glorot(key, shape):
    fan_in, fan_out = shape[0], shape[1]
    lim = (6.0 / (fan_in + fan_out)) ** 0.5
    return jax.random.uniform(key, shape, jnp.float32, -lim, lim)


def make_params(key, in_feats, n_hidden, n_layers=2):
    ks = jax.random.split(key, 16)
    conv_dims = [(in_feats, n_hidden)] + [(n_hidden, n_hidden)] * (n_layers - 1)
    conv_w = [glorot(ks[i], d) for i, d in enumerate(conv_dims)]
    conv_b = [jnp.zeros((1, n_hidden), jnp.float32) for _ in conv_dims]
    bn_gamma = [jnp.ones((1, n_hidden), jnp.float32) for _ in range(n_layers - 1)]
    bn_beta = [jnp.zeros((1, n_hidden), jnp.float32) for _ in range(n_layers - 1)]
    pred = {
        "w1": glorot(ks[8], (n_hidden, n_hidden)),
        "b1": jnp.zeros((1, n_hidden), jnp.float32),
        "w2": glorot(ks[9], (n_hidden, n_hidden)),
        "b2": jnp.zeros((1, n_hidden), jnp.float32),
        "w3": glorot(ks[10], (n_hidden, 1)),
        "b3": jnp.zeros((1, 1), jnp.float32),
    }
    return {"conv_w": conv_w, "conv_b": conv_b,
            "bn_gamma": bn_gamma, "bn_beta": bn_beta, "pred": pred}


def make_norm_adj(key, n):
    a = (jax.random.uniform(key, (n, n)) < 0.1).astype(jnp.float32)
    a = jnp.minimum(a + jnp.eye(n, dtype=jnp.float32), 1.0)  # add self loops
    deg = a.sum(axis=1)
    dinv = jax.lax.rsqrt(deg)
    return a * dinv[:, None] * dinv[None, :]  # D^{-1/2} A D^{-1/2}


if __name__ == "__main__":
    N, IN_FEATS, N_HIDDEN, N_LAYERS, E = 128, 32, 32, 2, 64

    key = jax.random.PRNGKey(0)
    k_par, k_a0, k_a1, k_x, k_pe, k_ne = jax.random.split(key, 6)

    params = make_params(k_par, IN_FEATS, N_HIDDEN, N_LAYERS)
    blocks = [make_norm_adj(k_a0, N), make_norm_adj(k_a1, N)]
    x = jax.random.normal(k_x, (N, IN_FEATS), jnp.float32)

    pos_edges = tuple(jax.random.randint(k, (E,), 0, N) for k in jax.random.split(k_pe, 2))
    neg_edges = tuple(jax.random.randint(k, (E,), 0, N) for k in jax.random.split(k_ne, 2))

    h_pos, h_neg = gcn_forward(params, blocks, x, pos_edges, neg_edges)
    jax.block_until_ready((h_pos, h_neg))

    # Verify against pure-JAX reference.
    r_pos, r_neg = gcn_forward_ref(params, blocks, x, pos_edges, neg_edges)
    assert h_pos.shape == (E, 1) and h_neg.shape == (E, 1)
    assert jnp.allclose(h_pos, r_pos, atol=1e-4, rtol=1e-4)
    assert jnp.allclose(h_neg, r_neg, atol=1e-4, rtol=1e-4)

    print("KERNEL_OK")
</pallas_src>

<mosaic_0001>
module attributes {stable_mosaic.version = 11 : i64} {
  func.func @kernel(%arg0: memref<128x1xi32, #tpu.memory_space<vmem>>, %arg1: memref<128x1xi32, #tpu.memory_space<vmem>>, %arg2: memref<128x128xf32, #tpu.memory_space<vmem>>, %arg3: memref<128x128xf32, #tpu.memory_space<vmem>>, %arg4: memref<128x128xf32, #tpu.memory_space<vmem>>, %arg5: memref<128x128xf32, #tpu.memory_space<vmem>>, %arg6: memref<128x128xf32, #tpu.memory_space<vmem>>, %arg7: memref<1x128xf32, #tpu.memory_space<vmem>>, %arg8: memref<1x128xf32, #tpu.memory_space<vmem>>, %arg9: memref<1x128xf32, #tpu.memory_space<vmem>>, %arg10: memref<1x128xf32, #tpu.memory_space<vmem>>, %arg11: memref<128x128xf32, #tpu.memory_space<vmem>>, %arg12: memref<1x128xf32, #tpu.memory_space<vmem>>, %arg13: memref<128x128xf32, #tpu.memory_space<vmem>>, %arg14: memref<1x128xf32, #tpu.memory_space<vmem>>, %arg15: memref<128x128xf32, #tpu.memory_space<vmem>>, %arg16: memref<1x128xf32, #tpu.memory_space<vmem>>, %arg17: memref<128x128xf32, #tpu.memory_space<vmem>>) attributes {dimension_semantics = [], scalar_prefetch = 0 : i64, scratch_operands = 0 : i64, tpu.core_type = #tpu.core_type<tc>} {
    %c0 = arith.constant 0 : index
    %c0_0 = arith.constant 0 : index
    %0 = vector.load %arg4[%c0, %c0_0] : memref<128x128xf32, #tpu.memory_space<vmem>>, vector<128x128xf32>
    %c0_1 = arith.constant 0 : index
    %c0_2 = arith.constant 0 : index
    %1 = vector.load %arg5[%c0_1, %c0_2] : memref<128x128xf32, #tpu.memory_space<vmem>>, vector<128x128xf32>
    %cst = arith.constant dense<0.000000e+00> : vector<128x128xf32>
    %2 = tpu.matmul %0, %1, %cst {dimension_numbers = #tpu.dot_dimension_numbers<[1], [0], [0], [1], [0, 0, 1, 1], [], []>} : vector<128x128xf32>, vector<128x128xf32>, vector<128x128xf32> -> vector<128x128xf32>
    %c0_3 = arith.constant 0 : index
    %c0_4 = arith.constant 0 : index
    %3 = vector.load %arg2[%c0_3, %c0_4] : memref<128x128xf32, #tpu.memory_space<vmem>>, vector<128x128xf32>
    %cst_5 = arith.constant dense<0.000000e+00> : vector<128x128xf32>
    %4 = tpu.matmul %3, %2, %cst_5 {dimension_numbers = #tpu.dot_dimension_numbers<[1], [0], [0], [1], [0, 0, 1, 1], [], []>} : vector<128x128xf32>, vector<128x128xf32>, vector<128x128xf32> -> vector<128x128xf32>
    %c0_6 = arith.constant 0 : index
    %c0_7 = arith.constant 0 : index
    %5 = vector.load %arg7[%c0_6, %c0_7] : memref<1x128xf32, #tpu.memory_space<vmem>>, vector<1x128xf32>
    %6 = vector.broadcast %5 : vector<1x128xf32> to vector<128x128xf32>
    %7 = arith.addf %4, %6 : vector<128x128xf32>
    %cst_8 = arith.constant dense<0.000000e+00> : vector<128xf32>
    %8 = vector.multi_reduction <add>, %7, %cst_8 [0] : vector<128x128xf32> to vector<128xf32>
    %9 = vector.shape_cast %8 : vector<128xf32> to vector<1x128xf32>
    %cst_9 = arith.constant 1.280000e+02 : f32
    %10 = vector.broadcast %cst_9 : f32 to vector<1x128xf32>
    %11 = arith.divf %9, %10 : vector<1x128xf32>
    %12 = vector.broadcast %11 : vector<1x128xf32> to vector<128x128xf32>
    %13 = arith.subf %7, %12 : vector<128x128xf32>
    %14 = arith.mulf %13, %13 : vector<128x128xf32>
    %cst_10 = arith.constant dense<0.000000e+00> : vector<128xf32>
    %15 = vector.multi_reduction <add>, %14, %cst_10 [0] : vector<128x128xf32> to vector<128xf32>
    %16 = vector.shape_cast %15 : vector<128xf32> to vector<1x128xf32>
    %cst_11 = arith.constant 1.280000e+02 : f32
    %17 = vector.broadcast %cst_11 : f32 to vector<1x128xf32>
    %18 = arith.divf %16, %17 : vector<1x128xf32>
    %c0_12 = arith.constant 0 : index
    %c0_13 = arith.constant 0 : index
    %19 = vector.load %arg9[%c0_12, %c0_13] : memref<1x128xf32, #tpu.memory_space<vmem>>, vector<1x128xf32>
    %cst_14 = arith.constant 9.99999974E-6 : f32
    %20 = vector.broadcast %cst_14 : f32 to vector<1x128xf32>
    %21 = arith.addf %18, %20 : vector<1x128xf32>
    %22 = math.rsqrt %21 : vector<1x128xf32>
    %23 = arith.mulf %19, %22 : vector<1x128xf32>
    %c0_15 = arith.constant 0 : index
    %c0_16 = arith.constant 0 : index
    %24 = vector.load %arg10[%c0_15, %c0_16] : memref<1x128xf32, #tpu.memory_space<vmem>>, vector<1x128xf32>
    %25 = arith.mulf %11, %23 : vector<1x128xf32>
    %26 = arith.subf %24, %25 : vector<1x128xf32>
    %27 = vector.broadcast %23 : vector<1x128xf32> to vector<128x128xf32>
    %28 = arith.mulf %7, %27 : vector<128x128xf32>
    %29 = vector.broadcast %26 : vector<1x128xf32> to vector<128x128xf32>
    %30 = arith.addf %28, %29 : vector<128x128xf32>
    %cst_17 = arith.constant 0.000000e+00 : f32
    %31 = vector.broadcast %cst_17 : f32 to vector<128x128xf32>
    %32 = arith.maximumf %30, %31 : vector<128x128xf32>
    %c0_18 = arith.constant 0 : index
    %c0_19 = arith.constant 0 : index
    %33 = vector.load %arg6[%c0_18, %c0_19] : memref<128x128xf32, #tpu.memory_space<vmem>>, vector<128x128xf32>
    %cst_20 = arith.constant dense<0.000000e+00> : vector<128x128xf32>
    %34 = tpu.matmul %32, %33, %cst_20 {dimension_numbers = #tpu.dot_dimension_numbers<[1], [0], [0], [1], [0, 0, 1, 1], [], []>} : vector<128x128xf32>, vector<128x128xf32>, vector<128x128xf32> -> vector<128x128xf32>
    %c0_21 = arith.constant 0 : index
    %c0_22 = arith.constant 0 : index
    %35 = vector.load %arg3[%c0_21, %c0_22] : memref<128x128xf32, #tpu.memory_space<vmem>>, vector<128x128xf32>
    %cst_23 = arith.constant dense<0.000000e+00> : vector<128x128xf32>
    %36 = tpu.matmul %35, %34, %cst_23 {dimension_numbers = #tpu.dot_dimension_numbers<[1], [0], [0], [1], [0, 0, 1, 1], [], []>} : vector<128x128xf32>, vector<128x128xf32>, vector<128x128xf32> -> vector<128x128xf32>
    %c0_24 = arith.constant 0 : index
    %c0_25 = arith.constant 0 : index
    %37 = vector.load %arg8[%c0_24, %c0_25] : memref<1x128xf32, #tpu.memory_space<vmem>>, vector<1x128xf32>
    %38 = vector.broadcast %37 : vector<1x128xf32> to vector<128x128xf32>
    %39 = arith.addf %36, %38 : vector<128x128xf32>
    %40 = tpu.iota {dimensions = array<i32: 1>} : vector<128x128xi32>
    %c0_26 = arith.constant 0 : index
    %c0_27 = arith.constant 0 : index
    %41 = vector.load %arg0[%c0_26, %c0_27] : memref<128x1xi32, #tpu.memory_space<vmem>>, vector<128x1xi32>
    %42 = vector.broadcast %41 : vector<128x1xi32> to vector<128x128xi32>
    %43 = arith.cmpi eq, %40, %42 : vector<128x128xi32>
    %44 = arith.extui %43 : vector<128x128xi1> to vector<128x128xi32>
    %45 = arith.sitofp %44 : vector<128x128xi32> to vector<128x128xf32>
    %c0_28 = arith.constant 0 : index
    %c0_29 = arith.constant 0 : index
    %46 = vector.load %arg1[%c0_28, %c0_29] : memref<128x1xi32, #tpu.memory_space<vmem>>, vector<128x1xi32>
    %47 = vector.broadcast %46 : vector<128x1xi32> to vector<128x128xi32>
    %48 = arith.cmpi eq, %40, %47 : vector<128x128xi32>
    %49 = arith.extui %48 : vector<128x128xi1> to vector<128x128xi32>
    %50 = arith.sitofp %49 : vector<128x128xi32> to vector<128x128xf32>
    %cst_30 = arith.constant dense<0.000000e+00> : vector<128x128xf32>
    %51 = tpu.matmul %45, %39, %cst_30 {dimension_numbers = #tpu.dot_dimension_numbers<[1], [0], [0], [1], [0, 0, 1, 1], [], []>} : vector<128x128xf32>, vector<128x128xf32>, vector<128x128xf32> -> vector<128x128xf32>
    %cst_31 = arith.constant dense<0.000000e+00> : vector<128x128xf32>
    %52 = tpu.matmul %50, %39, %cst_31 {dimension_numbers = #tpu.dot_dimension_numbers<[1], [0], [0], [1], [0, 0, 1, 1], [], []>} : vector<128x128xf32>, vector<128x128xf32>, vector<128x128xf32> -> vector<128x128xf32>
    %53 = arith.mulf %51, %52 : vector<128x128xf32>
    %c0_32 = arith.constant 0 : index
    %c0_33 = arith.constant 0 : index
    %54 = vector.load %arg11[%c0_32, %c0_33] : memref<128x128xf32, #tpu.memory_space<vmem>>, vector<128x128xf32>
    %cst_34 = arith.constant dense<0.000000e+00> : vector<128x128xf32>
    %55 = tpu.matmul %53, %54, %cst_34 {dimension_numbers = #tpu.dot_dimension_numbers<[1], [0], [0], [1], [0, 0, 1, 1], [], []>} : vector<128x128xf32>, vector<128x128xf32>, vector<128x128xf32> -> vector<128x128xf32>
    %c0_35 = arith.constant 0 : index
    %c0_36 = arith.constant 0 : index
    %56 = vector.load %arg12[%c0_35, %c0_36] : memref<1x128xf32, #tpu.memory_space<vmem>>, vector<1x128xf32>
    %57 = vector.broadcast %56 : vector<1x128xf32> to vector<128x128xf32>
    %58 = arith.addf %55, %57 : vector<128x128xf32>
    %cst_37 = arith.constant 0.000000e+00 : f32
    %59 = vector.broadcast %cst_37 : f32 to vector<128x128xf32>
    %60 = arith.maximumf %58, %59 : vector<128x128xf32>
    %c0_38 = arith.constant 0 : index
    %c0_39 = arith.constant 0 : index
    %61 = vector.load %arg13[%c0_38, %c0_39] : memref<128x128xf32, #tpu.memory_space<vmem>>, vector<128x128xf32>
    %cst_40 = arith.constant dense<0.000000e+00> : vector<128x128xf32>
    %62 = tpu.matmul %60, %61, %cst_40 {dimension_numbers = #tpu.dot_dimension_numbers<[1], [0], [0], [1], [0, 0, 1, 1], [], []>} : vector<128x128xf32>, vector<128x128xf32>, vector<128x128xf32> -> vector<128x128xf32>
    %c0_41 = arith.constant 0 : index
    %c0_42 = arith.constant 0 : index
    %63 = vector.load %arg14[%c0_41, %c0_42] : memref<1x128xf32, #tpu.memory_space<vmem>>, vector<1x128xf32>
    %64 = vector.broadcast %63 : vector<1x128xf32> to vector<128x128xf32>
    %65 = arith.addf %62, %64 : vector<128x128xf32>
    %cst_43 = arith.constant 0.000000e+00 : f32
    %66 = vector.broadcast %cst_43 : f32 to vector<128x128xf32>
    %67 = arith.maximumf %65, %66 : vector<128x128xf32>
    %c0_44 = arith.constant 0 : index
    %c0_45 = arith.constant 0 : index
    %68 = vector.load %arg15[%c0_44, %c0_45] : memref<128x128xf32, #tpu.memory_space<vmem>>, vector<128x128xf32>
    %cst_46 = arith.constant dense<0.000000e+00> : vector<128x128xf32>
    %69 = tpu.matmul %67, %68, %cst_46 {dimension_numbers = #tpu.dot_dimension_numbers<[1], [0], [0], [1], [0, 0, 1, 1], [], []>} : vector<128x128xf32>, vector<128x128xf32>, vector<128x128xf32> -> vector<128x128xf32>
    %c0_47 = arith.constant 0 : index
    %c0_48 = arith.constant 0 : index
    %70 = vector.load %arg16[%c0_47, %c0_48] : memref<1x128xf32, #tpu.memory_space<vmem>>, vector<1x128xf32>
    %71 = vector.broadcast %70 : vector<1x128xf32> to vector<128x128xf32>
    %72 = arith.addf %69, %71 : vector<128x128xf32>
    %c0_49 = arith.constant 0 : index
    %c0_50 = arith.constant 0 : index
    %73 = vector.load %arg17[%c0_49, %c0_50] : memref<128x128xf32, #tpu.memory_space<vmem>>, vector<128x128xf32>
    tpu.vector_store %arg17[%c0_49, %c0_50], %72 {strides = array<i32>} : memref<128x128xf32, #tpu.memory_space<vmem>>, vector<128x128xf32>,
    return
  }
}

</mosaic_0001>

<bundles_post_ra>
// kernel: tpu_custom_call.1
= control target key start
LH: loop header
LB: loop body
LE: loop exit
PB: predicated region body
PF: predicated region fallthrough
CT: control target
= control target key end

     0   :  { %s2216_s0 = inlined_call_operand.vmem [shape: s32[128,1], index: 0, kind: input, shape index: {}]   ;;  %s2217_s1 = inlined_call_operand.vmem [shape: s32[128,1], index: 1, kind: input, shape index: {}]   ;;  %s2218_s2 = inlined_call_operand.vmem [shape: f32[128,128], index: 2, kind: input, shape index: {}]   ;;  %s2219_s3 = inlined_call_operand.vmem [shape: f32[128,128], index: 3, kind: input, shape index: {}]   ;;  %s2220_s4 = inlined_call_operand.hbm [shape: f32[128,128], index: 4, kind: input, shape index: {}]   ;;  %s2221_s5 = inlined_call_operand.hbm [shape: f32[128,128], index: 5, kind: input, shape index: {}]   ;;  %s2222_s6 = inlined_call_operand.hbm [shape: f32[128,128], index: 6, kind: input, shape index: {}]   ;;  %s2223_s7 = inlined_call_operand.vmem [shape: f32[1,128], index: 7, kind: input, shape index: {}]   ;;  %s2224_s8 = inlined_call_operand.vmem [shape: f32[1,128], index: 8, kind: input, shape index: {}]   ;;  %s2225_s9 = inlined_call_operand.vmem [shape: f32[1,128], index: 9, kind: input, shape index: {}]   ;;  %s2226_s10 = inlined_call_operand.vmem [shape: f32[1,128], index: 10, kind: input, shape index: {}]   ;;  %s2227_s11 = inlined_call_operand.hbm [shape: f32[128,128], index: 11, kind: input, shape index: {}]   ;;  %s2228_s12 = inlined_call_operand.vmem [shape: f32[1,128], index: 12, kind: input, shape index: {}]   ;;  %s2229_s13 = inlined_call_operand.hbm [shape: f32[128,128], index: 13, kind: input, shape index: {}]   ;;  %s2230_s14 = inlined_call_operand.vmem [shape: f32[1,128], index: 14, kind: input, shape index: {}]   ;;  %s2231_s15 = inlined_call_operand.hbm [shape: f32[128,128], index: 15, kind: input, shape index: {}]   ;;  %s2232_s16 = inlined_call_operand.vmem [shape: f32[1,128], index: 16, kind: input, shape index: {}]   ;;  %s2233_s17 = inlined_call_operand.hbm [shape: f32[128,128], index: 17, kind: output, shape index: {}]  }
   0x1   :  { %2236 = sst [smem:[#allocation19_spill]] %s2216_s0 }
   0x2   :  { %2237 = sst [smem:[#allocation20_spill]] %s2217_s1 }
   0x3   :  { %22 = vsyncpa [#allocation3], 0 }
   0x4   :  { %23 = vsyncpa [#allocation6], 0 }
   0x5   :  { %24 = vsyncpa [#allocation9], 0 }
   0x6   :  { %25 = vsyncpa [#allocation12], 0 }
   0x7   :  { %26 = vsyncpa [#allocation4], 0  ;;  %s52_s26 = sshll.u32 %s2221_s5, 4  ;;  %s1663_s27 = smov [#allocation5]   ;;  %s53_s26 = int_to_ptr.hbm [resolvable:$true] %s52_s26 }
   0x8   :  { %s54_s28 = sshll.u32 %s1663_s27, 4  ;;  %s86_s30 = sshll.u32 %s2227_s11, 4  ;;  %s55_s28 = int_to_ptr.vmem [resolvable:$true] %s54_s28  ;;  %s87_s30 = int_to_ptr.hbm [resolvable:$true] %s86_s30 }
   0x9   :  { %s1664_s18 = smov 128   ;;  %s1665_s19 = smov 8  }
   0xa   :  { %60 = dma.hbm_to_vmem [thread:$0]  %s53_s26, 2048, %s55_s28, [#allocation6], %s1664_s18, %s1664_s18, %s1665_s19  }
   0xb   :  { %s1666_s1 = smov [#allocation8]   ;;  %s39_s5 = sshll.u32 %s2220_s4, 4  ;;  %s40_s5 = int_to_ptr.hbm [resolvable:$true] %s39_s5 }
   0xc   :  { %s88_s20 = sshll.u32 %s1666_s1, 4  ;;  %s65_s24 = sshll.u32 %s2222_s6, 4  ;;  %s89_s20 = int_to_ptr.vmem [resolvable:$true] %s88_s20  ;;  %s66_s24 = int_to_ptr.hbm [resolvable:$true] %s65_s24 }
   0xd   :  { %94 = dma.hbm_to_vmem [thread:$0]  %s87_s30, 2048, %s89_s20, [#allocation9], %s1664_s18, %s1664_s18, %s1665_s19  }
   0xe   :  { %s1667_s25 = smov [#allocation2]   ;;  %s1668_s26 = smov [#allocation7]  }
   0xf   :  { %s41_s27 = sshll.u32 %s1667_s25, 4  ;;  %s67_s4 = sshll.u32 %s1668_s26, 4  ;;  %s42_s27 = int_to_ptr.vmem [resolvable:$true] %s41_s27  ;;  %s68_s4 = int_to_ptr.vmem [resolvable:$true] %s67_s4 }
  0x10   :  { %47 = dma.hbm_to_vmem [thread:$0]  %s40_s5, 2048, %s42_s27, [#allocation3], %s1664_s18, %s1664_s18, %s1665_s19  }
  0x11   :  { %s101_s0 = sshll.u32 %s2229_s13, 4  ;;  %s116_s1 = sshll.u32 %s2231_s15, 4  ;;  %s102_s0 = int_to_ptr.hbm [resolvable:$true] %s101_s0  ;;  %s117_s1 = int_to_ptr.hbm [resolvable:$true] %s116_s1 }
  0x12   :  { %73 = dma.hbm_to_vmem [thread:$0]  %s66_s24, 2048, %s68_s4, [#allocation6], %s1664_s18, %s1664_s18, %s1665_s19  }
  0x13   :  { %s1669_s20 = smov [#allocation10]   ;;  %s1670_s22 = smov [#allocation11]  }
  0x14   :  { %s103_s21 = sshll.u32 %s1669_s20, 4  ;;  %s118_s13 = sshll.u32 %s1670_s22, 4  ;;  %s104_s21 = int_to_ptr.vmem [resolvable:$true] %s103_s21  ;;  %s119_s13 = int_to_ptr.vmem [resolvable:$true] %s118_s13 }
  0x15   :  { %109 = dma.hbm_to_vmem [thread:$0]  %s102_s0, 2048, %s104_s21, [#allocation9], %s1664_s18, %s1664_s18, %s1665_s19  }
  0x16   :  { %124 = dma.hbm_to_vmem [thread:$0]  %s117_s1, 2048, %s119_s13, [#allocation12], %s1664_s18, %s1664_s18, %s1665_s19  }
  0x17   :  { %1653 = dma.done.wait [#allocation3], 2048  }
  0x18   :  { %1654 = vsyncadd [#allocation3], 4294965248 }
  0x19   :  { %1655 = dma.done.wait [#allocation6], 4096  }
  0x1a   :  { %1656 = vsyncadd [#allocation6], 4294963200 }
  0x1b   :  { %1657 = dma.done.wait [#allocation9], 4096  }
  0x1c   :  { %1658 = vsyncadd [#allocation9], 4294963200 }
  0x1d   :  { %1659 = dma.done.wait [#allocation12], 2048  }
  0x1e   :  { %1660 = vsyncadd [#allocation12], 4294965248  ;;  %v182_v0 = vld [vmem:[#allocation5 + $0x78] sm:$0xff]  ;;  %v181_v1 = vld [vmem:[#allocation5 + $0x70] sm:$0xff]  ;;  %s2238_s1 = sld [smem:[#allocation19_spill]]  ;;  %s1333_s6 = sshll.u32 %s2233_s17, 4  ;;  %s1334_s6 = int_to_ptr.hbm [resolvable:$true] %s1333_s6 }
  0x1f   :  { %1415 = vmatpush.msra.mxu3 %v182_v0  ;;  %1414 = vmatpush.msra.mxu2 %v182_v0  ;;  %v180_v2 = vld [vmem:[#allocation5 + $0x68] sm:$0xff]  ;;  %v179_v3 = vld [vmem:[#allocation5 + $0x60] sm:$0xff]  ;;  %v178_v4 = vld [vmem:[#allocation5 + $0x58] sm:$0xff]  ;;  %s2239_s22 = sld [smem:[#allocation20_spill]] }
  0x20   :  { %1413 = vmatpush.msra.mxu1 %v182_v0  ;;  %183 = vmatpush.msra.mxu0 %v182_v0  ;;  %v177_v5 = vld [vmem:[#allocation5 + $0x50] sm:$0xff]  ;;  %v176_v6 = vld [vmem:[#allocation5 + $0x48] sm:$0xff]  ;;  %v175_v7 = vld [vmem:[#allocation5 + $0x40] sm:$0xff] }
  0x21   :  { %1418 = vmatpush.msra.mxu3 %v181_v1  ;;  %1417 = vmatpush.msra.mxu2 %v181_v1  ;;  %v174_v8 = vld [vmem:[#allocation5 + $0x38] sm:$0xff]  ;;  %v173_v9 = vld [vmem:[#allocation5 + $0x30] sm:$0xff]  ;;  %v172_v10 = vld [vmem:[#allocation5 + $0x28] sm:$0xff] }
  0x22   :  { %1416 = vmatpush.msra.mxu1 %v181_v1  ;;  %184 = vmatpush.msra.mxu0 %v181_v1  ;;  %v171_v11 = vld [vmem:[#allocation5 + $0x20] sm:$0xff]  ;;  %v170_v12 = vld [vmem:[#allocation5 + $0x18] sm:$0xff]  ;;  %v169_v13 = vld [vmem:[#allocation5 + $0x10] sm:$0xff] }
  0x23   :  { %1421 = vmatpush.msra.mxu3 %v180_v2  ;;  %1420 = vmatpush.msra.mxu2 %v180_v2  ;;  %v168_v14 = vld [vmem:[#allocation5 + $0x8] sm:$0xff]  ;;  %v167_v15 = vld [vmem:[#allocation5] sm:$0xff]  ;;  %v165_v24 = vld [vmem:[#allocation2 + $0x70] sm:$0xff] }
  0x24   :  { %1419 = vmatpush.msra.mxu1 %v180_v2  ;;  %185 = vmatpush.msra.mxu0 %v180_v2  ;;  %v163_v16 = vld [vmem:[#allocation2 + $0x60] sm:$0xff]  ;;  %v164_v20 = vld [vmem:[#allocation2 + $0x68] sm:$0xff]  ;;  %v161_v25 = vld [vmem:[#allocation2 + $0x50] sm:$0xff] }
  0x25   :  { %1424 = vmatpush.msra.mxu3 %v179_v3  ;;  %1423 = vmatpush.msra.mxu2 %v179_v3  ;;  %v159_v17 = vld [vmem:[#allocation2 + $0x40] sm:$0xff]  ;;  %v160_v21 = vld [vmem:[#allocation2 + $0x48] sm:$0xff]  ;;  %v157_v26 = vld [vmem:[#allocation2 + $0x30] sm:$0xff] }
  0x26   :  { %1422 = vmatpush.msra.mxu1 %v179_v3  ;;  %186 = vmatpush.msra.mxu0 %v179_v3  ;;  %v155_v18 = vld [vmem:[#allocation2 + $0x20] sm:$0xff]  ;;  %v156_v22 = vld [vmem:[#allocation2 + $0x28] sm:$0xff]  ;;  %v153_v27 = vld [vmem:[#allocation2 + $0x10] sm:$0xff] }
  0x27   :  { %1427 = vmatpush.msra.mxu3 %v178_v4  ;;  %1426 = vmatpush.msra.mxu2 %v178_v4  ;;  %v151_v19 = vld [vmem:[#allocation2] sm:$0xff]  ;;  %v152_v23 = vld [vmem:[#allocation2 + $0x8] sm:$0xff]  ;;  %v166_v28 = vld [vmem:[#allocation2 + $0x78] sm:$0xff] }
  0x28   :  { %1425 = vmatpush.msra.mxu1 %v178_v4  ;;  %187 = vmatpush.msra.mxu0 %v178_v4  ;;  %v162_v29 = vld [vmem:[#allocation2 + $0x58] sm:$0xff]  ;;  %v248_v48 = vld [vmem:[%s2218_s2] sm:$0xff]  ;;  %v249_v49 = vld [vmem:[%s2218_s2 + $0x8] sm:$0xff] }
  0x29   :  { %1430 = vmatpush.msra.mxu3 %v177_v5  ;;  %1429 = vmatpush.msra.mxu2 %v177_v5  ;;  %v158_v30 = vld [vmem:[#allocation2 + $0x38] sm:$0xff]  ;;  %v250_v50 = vld [vmem:[%s2218_s2 + $0x10] sm:$0xff]  ;;  %v252_v52 = vld [vmem:[%s2218_s2 + $0x20] sm:$0xff] }
  0x2a   :  { %1428 = vmatpush.msra.mxu1 %v177_v5  ;;  %188 = vmatpush.msra.mxu0 %v177_v5  ;;  %v154_v31 = vld [vmem:[#allocation2 + $0x18] sm:$0xff]  ;;  %v253_v53 = vld [vmem:[%s2218_s2 + $0x28] sm:$0xff]  ;;  %v254_v54 = vld [vmem:[%s2218_s2 + $0x30] sm:$0xff] }
  0x2b   :  { %1433 = vmatpush.msra.mxu3 %v176_v6  ;;  %1432 = vmatpush.msra.mxu2 %v176_v6  ;;  %v251_v51 = vld [vmem:[%s2218_s2 + $0x18] sm:$0xff]  ;;  %v256_v56 = vld [vmem:[%s2218_s2 + $0x40] sm:$0xff]  ;;  %v257_v57 = vld [vmem:[%s2218_s2 + $0x48] sm:$0xff] }
  0x2c   :  { %1431 = vmatpush.msra.mxu1 %v176_v6  ;;  %189 = vmatpush.msra.mxu0 %v176_v6  ;;  %v255_v55 = vld [vmem:[%s2218_s2 + $0x38] sm:$0xff]  ;;  %v258_v58 = vld [vmem:[%s2218_s2 + $0x50] sm:$0xff]  ;;  %v260_v60 = vld [vmem:[%s2218_s2 + $0x60] sm:$0xff] }
  0x2d   :  { %1436 = vmatpush.msra.mxu3 %v175_v7  ;;  %1435 = vmatpush.msra.mxu2 %v175_v7  ;;  %v259_v59 = vld [vmem:[%s2218_s2 + $0x58] sm:$0xff]  ;;  %v261_v61 = vld [vmem:[%s2218_s2 + $0x68] sm:$0xff]  ;;  %v262_v62 = vld [vmem:[%s2218_s2 + $0x70] sm:$0xff] }
  0x2e   :  { %1434 = vmatpush.msra.mxu1 %v175_v7  ;;  %190 = vmatpush.msra.mxu0 %v175_v7  ;;  %v263_v63 = vld [vmem:[%s2218_s2 + $0x78] sm:$0xff] }
  0x2f   :  { %1439 = vmatpush.msra.mxu3 %v174_v8  ;;  %1438 = vmatpush.msra.mxu2 %v174_v8 }
  0x30   :  { %1437 = vmatpush.msra.mxu1 %v174_v8  ;;  %191 = vmatpush.msra.mxu0 %v174_v8 }
  0x31   :  { %1442 = vmatpush.msra.mxu3 %v173_v9  ;;  %1441 = vmatpush.msra.mxu2 %v173_v9 }
  0x32   :  { %1440 = vmatpush.msra.mxu1 %v173_v9  ;;  %192 = vmatpush.msra.mxu0 %v173_v9 }
  0x33   :  { %1445 = vmatpush.msra.mxu3 %v172_v10  ;;  %1444 = vmatpush.msra.mxu2 %v172_v10 }
  0x34   :  { %1443 = vmatpush.msra.mxu1 %v172_v10  ;;  %193 = vmatpush.msra.mxu0 %v172_v10 }
  0x35   :  { %1448 = vmatpush.msra.mxu3 %v171_v11  ;;  %1447 = vmatpush.msra.mxu2 %v171_v11 }
  0x36   :  { %1446 = vmatpush.msra.mxu1 %v171_v11  ;;  %194 = vmatpush.msra.mxu0 %v171_v11 }
  0x37   :  { %1451 = vmatpush.msra.mxu3 %v170_v12  ;;  %1450 = vmatpush.msra.mxu2 %v170_v12 }
  0x38   :  { %1449 = vmatpush.msra.mxu1 %v170_v12  ;;  %195 = vmatpush.msra.mxu0 %v170_v12  ;;  %v1476_v12 = vld [vmem:[%s2223_s7] ss:$0 sm:$0xff] }
  0x39   :  { %1454 = vmatpush.msra.mxu3 %v169_v13  ;;  %1453 = vmatpush.msra.mxu2 %v169_v13 }
  0x3a   :  { %1452 = vmatpush.msra.mxu1 %v169_v13  ;;  %196 = vmatpush.msra.mxu0 %v169_v13 }
  0x3b   :  { %1457 = vmatpush.msra.mxu3 %v168_v14  ;;  %1456 = vmatpush.msra.mxu2 %v168_v14 }
  0x3c   :  { %1455 = vmatpush.msra.mxu1 %v168_v14  ;;  %197 = vmatpush.msra.mxu0 %v168_v14 }
  0x3d   :  { %1460 = vmatpush.msra.mxu3 %v167_v15  ;;  %1459 = vmatpush.msra.mxu2 %v167_v15 }
  0x3e   :  { %235 = vmatmul.f32.vlgmr.msra.gmra.mxu3 %v163_v16  ;;  %223 = vmatmul.f32.vlgmr.msra.gmra.mxu2 %v159_v17 }
  0x3f   :  { %1458 = vmatpush.msra.mxu1 %v167_v15  ;;  %198 = vmatpush.msra.mxu0 %v167_v15 }
  0x40   :  { %211 = vmatmul.f32.vlgmr.msra.gmra.mxu1 %v155_v18  ;;  %199 = vmatmul.f32.vlgmr.msra.gmra.mxu0 %v151_v19 }
  0x46   :  { %238 = vmatmul.f32.gmra.mxu3 %v164_v20  ;;  %226 = vmatmul.f32.gmra.mxu2 %v160_v21 }
  0x48   :  { %214 = vmatmul.f32.gmra.mxu1 %v156_v22  ;;  %202 = vmatmul.f32.gmra.mxu0 %v152_v23 }
  0x4e   :  { %241 = vmatmul.f32.gmra.mxu3 %v165_v24  ;;  %229 = vmatmul.f32.gmra.mxu2 %v161_v25 }
  0x50   :  { %217 = vmatmul.f32.gmra.mxu1 %v157_v26  ;;  %205 = vmatmul.f32.gmra.mxu0 %v153_v27 }
  0x56   :  { %244 = vmatmul.f32.gmra.mxu3 %v166_v28  ;;  %232 = vmatmul.f32.gmra.mxu2 %v162_v29 }
  0x58   :  { %220 = vmatmul.f32.gmra.mxu1 %v158_v30  ;;  %208 = vmatmul.f32.gmra.mxu0 %v154_v31 }
  0xbd   :  { %v212_v35 = vpop.f32.mrf.mxu1  ;;  %v200_v38 = vpop.f32.mrf.mxu0 }
  0xc1   :  { %v236_v32 = vpop.f32.mrf.mxu3  ;;  %v224_v33 = vpop.f32.mrf.mxu2 }
  0xc5   :  { %v215_v39 = vpop.f32.mrf.mxu1  ;;  %v203_v42 = vpop.f32.mrf.mxu0 }
  0xc9   :  { %v239_v34 = vpop.f32.mrf.mxu3  ;;  %v227_v36 = vpop.f32.mrf.mxu2 }
  0xcd   :  { %v218_v43 = vpop.f32.mrf.mxu1  ;;  %v206_v45 = vpop.f32.mrf.mxu0 }
  0xd1   :  { %v242_v37 = vpop.f32.mrf.mxu3  ;;  %v230_v40 = vpop.f32.mrf.mxu2 }
  0xd5   :  { %v221_v46 = vpop.f32.mrf.mxu1  ;;  %v209_v47 = vpop.f32.mrf.mxu0 }
  0xd9   :  { %v245_v41 = vpop.f32.mrf.mxu3  ;;  %v233_v44 = vpop.f32.mrf.mxu2 }
  0xda   :  { %268 = vmatpush.msrb.mxu1 %v245_v41 }
  0xdc   :  { %269 = vmatpush.msrb.mxu1 %v242_v37 }
  0xde   :  { %270 = vmatpush.msrb.mxu1 %v239_v34  ;;  %v1671_v34 = vmov 128.0  }
  0xdf   :  { %1481 = vrcp.f32 %v1671_v34 }
  0xe0   :  { %271 = vmatpush.msrb.mxu1 %v236_v32 }
  0xe2   :  { %272 = vmatpush.msrb.mxu1 %v233_v44 }
  0xe4   :  { %273 = vmatpush.msrb.mxu1 %v230_v40 }
  0xe5   :  { %v1482_v40 = vpop.eup %1481 }
  0xe6   :  { %274 = vmatpush.msrb.mxu1 %v227_v36  ;;  %vm359_vm0 = vweird.f32 %v1482_v40 }
  0xe8   :  { %275 = vmatpush.msrb.mxu1 %v224_v33 }
  0xea   :  { %276 = vmatpush.msrb.mxu1 %v221_v46 }
  0xec   :  { %277 = vmatpush.msrb.mxu1 %v218_v43 }
  0xee   :  { %278 = vmatpush.msrb.mxu1 %v215_v39 }
  0xf0   :  { %279 = vmatpush.msrb.mxu1 %v212_v35 }
  0xf2   :  { %280 = vmatpush.msrb.mxu1 %v209_v47 }
  0xf4   :  { %281 = vmatpush.msrb.mxu1 %v206_v45  ;;  %v355_v45 = vmul.f32 128.0, %v1482_v40 }
  0xf6   :  { %282 = vmatpush.msrb.mxu1 %v203_v42 }
  0xf8   :  { %283 = vmatpush.msrb.mxu1 %v200_v38 }
  0xf9   :  { %284 = vmatmul.f32.vlgmr.msrb.gmra.mxu1 %v248_v48 }
 0x101   :  { %287 = vmatmul.f32.gmra.mxu1 %v249_v49 }
 0x109   :  { %290 = vmatmul.f32.gmra.mxu1 %v250_v50  ;;  %v356_v50 = vsub.f32 1.0, %v355_v45 }
 0x111   :  { %293 = vmatmul.f32.gmra.mxu1 %v251_v51 }
 0x119   :  { %296 = vmatmul.f32.gmra.mxu1 %v252_v52 }
 0x121   :  { %299 = vmatmul.f32.gmra.mxu1 %v253_v53  ;;  %v357_v53 = vmul.f32 %v1482_v40, %v356_v50 }
 0x129   :  { %302 = vmatmul.f32.gmra.mxu1 %v254_v54 }
 0x131   :  { %305 = vmatmul.f32.gmra.mxu1 %v255_v55 }
 0x139   :  { %308 = vmatmul.f32.gmra.mxu1 %v256_v56  ;;  %v358_v56 = vadd.f32 %v1482_v40, %v357_v53  ;;  %v498_v53 = vld [vmem:[#allocation7 + $0x60] sm:$0xff] }
 0x141   :  { %311 = vmatmul.f32.gmra.mxu1 %v257_v57 }
 0x149   :  { %314 = vmatmul.f32.gmra.mxu1 %v258_v58 }
 0x151   :  { %317 = vmatmul.f32.gmra.mxu1 %v259_v59  ;;  %v1900_v59 = vsel %vm359_vm0, %v1482_v40, %v358_v56 }
 0x159   :  { %320 = vmatmul.f32.gmra.mxu1 %v260_v60 }
 0x161   :  { %323 = vmatmul.f32.gmra.mxu1 %v261_v61 }
 0x169   :  { %326 = vmatmul.f32.gmra.mxu1 %v262_v62 }
 0x171   :  { %329 = vmatmul.f32.gmra.mxu1 %v263_v63 }
 0x176   :  { %v285_v0 = vpop.f32.mrf.mxu1 }
 0x177   :  { %v1854_v14 = vadd.f32 %v1476_v12, %v285_v0 }
 0x17e   :  { %v288_v1 = vpop.f32.mrf.mxu1 }
 0x17f   :  { %v1852_v13 = vadd.f32 %v1476_v12, %v288_v1 }
 0x181   :  { %v333_v16 = vadd.f32 %v1852_v13, %v1854_v14 }
 0x186   :  { %v291_v2 = vpop.f32.mrf.mxu1 }
 0x187   :  { %v1856_v15 = vadd.f32 %v1476_v12, %v291_v2 }
 0x189   :  { %v334_v19 = vadd.f32 %v333_v16, %v1856_v15 }
 0x18e   :  { %v294_v3 = vpop.f32.mrf.mxu1 }
 0x18f   :  { %v1860_v17 = vadd.f32 %v1476_v12, %v294_v3 }
 0x191   :  { %v335_v21 = vadd.f32 %v334_v19, %v1860_v17 }
 0x196   :  { %v297_v4 = vpop.f32.mrf.mxu1 }
 0x197   :  { %v1863_v20 = vadd.f32 %v1476_v12, %v297_v4 }
 0x199   :  { %v336_v23 = vadd.f32 %v335_v21, %v1863_v20 }
 0x19e   :  { %v300_v5 = vpop.f32.mrf.mxu1 }
 0x19f   :  { %v1866_v22 = vadd.f32 %v1476_v12, %v300_v5 }
 0x1a1   :  { %v337_v25 = vadd.f32 %v336_v23, %v1866_v22 }
 0x1a6   :  { %v303_v6 = vpop.f32.mrf.mxu1 }
 0x1a7   :  { %v1869_v24 = vadd.f32 %v1476_v12, %v303_v6 }
 0x1a9   :  { %v338_v28 = vadd.f32 %v337_v25, %v1869_v24 }
 0x1ae   :  { %v306_v7 = vpop.f32.mrf.mxu1 }
 0x1af   :  { %v1872_v26 = vadd.f32 %v1476_v12, %v306_v7 }
 0x1b1   :  { %v339_v30 = vadd.f32 %v338_v28, %v1872_v26 }
 0x1b6   :  { %v309_v8 = vpop.f32.mrf.mxu1 }
 0x1b7   :  { %v1875_v29 = vadd.f32 %v1476_v12, %v309_v8 }
 0x1b9   :  { %v340_v32 = vadd.f32 %v339_v30, %v1875_v29 }
 0x1be   :  { %v312_v9 = vpop.f32.mrf.mxu1 }
 0x1bf   :  { %v1878_v31 = vadd.f32 %v1476_v12, %v312_v9 }
 0x1c1   :  { %v341_v35 = vadd.f32 %v340_v32, %v1878_v31 }
 0x1c6   :  { %v315_v10 = vpop.f32.mrf.mxu1 }
 0x1c7   :  { %v1881_v33 = vadd.f32 %v1476_v12, %v315_v10 }
 0x1c9   :  { %v342_v38 = vadd.f32 %v341_v35, %v1881_v33 }
 0x1ce   :  { %v318_v11 = vpop.f32.mrf.mxu1 }
 0x1cf   :  { %v1884_v36 = vadd.f32 %v1476_v12, %v318_v11 }
 0x1d1   :  { %v343_v41 = vadd.f32 %v342_v38, %v1884_v36 }
 0x1d6   :  { %v321_v18 = vpop.f32.mrf.mxu1 }
 0x1d7   :  { %v1887_v39 = vadd.f32 %v1476_v12, %v321_v18 }
 0x1d9   :  { %v344_v43 = vadd.f32 %v343_v41, %v1887_v39 }
 0x1de   :  { %v324_v27 = vpop.f32.mrf.mxu1 }
 0x1df   :  { %v1890_v42 = vadd.f32 %v1476_v12, %v324_v27 }
 0x1e1   :  { %v345_v46 = vadd.f32 %v344_v43, %v1890_v42  ;;  %v500_v43 = vld [vmem:[#allocation7 + $0x70] sm:$0xff] }
 0x1e6   :  { %v327_v37 = vpop.f32.mrf.mxu1 }
 0x1e7   :  { %v1893_v44 = vadd.f32 %v1476_v12, %v327_v37  ;;  %v501_v37 = vld [vmem:[#allocation7 + $0x78] sm:$0xff] }
 0x1e8   :  { %502 = vmatpush.msrb.mxu2 %v501_v37 }
 0x1e9   :  { %v346_v48 = vadd.f32 %v345_v46, %v1893_v44 }
 0x1ea   :  { %503 = vmatpush.msrb.mxu2 %v500_v43 }
 0x1ee   :  { %v330_v47 = vpop.f32.mrf.mxu1 }
 0x1ef   :  { %v1897_v49 = vadd.f32 %v1476_v12, %v330_v47 }
 0x1f1   :  { %v347_v51 = vadd.f32 %v346_v48, %v1897_v49  ;;  %v499_v48 = vld [vmem:[#allocation7 + $0x68] sm:$0xff] }
 0x1f2   :  { %504 = vmatpush.msrb.mxu2 %v499_v48 }
 0x1f3   :  { %v348_v52 = vrot.slane %v347_v51, 4 }
 0x1f4   :  { %505 = vmatpush.msrb.mxu2 %v498_v53 }
 0x1f5   :  { %v349_v54 = vadd.f32 %v348_v52, %v347_v51 }
 0x1f7   :  { %v350_v55 = vrot.slane %v349_v54, 2 }
 0x1f9   :  { %v351_v57 = vadd.f32 %v350_v55, %v349_v54 }
 0x1fb   :  { %v352_v58 = vrot.slane %v351_v57, 1 }
 0x1fd   :  { %v353_v60 = vadd.f32 %v352_v58, %v351_v57  ;;  %v497_v57 = vld [vmem:[#allocation7 + $0x58] sm:$0xff] }
 0x1fe   :  { %506 = vmatpush.msrb.mxu2 %v497_v57 }
 0x1ff   :  { %v1903_v61 = vmul.f32 %v1900_v59, %v353_v60 }
 0x201   :  { %v362_v62 = vsub.f32 %v1854_v14, %v1903_v61  ;;  %v363_v63 = vsub.f32 %v1852_v13, %v1903_v61  ;;  %v364_v0 = vsub.f32 %v1856_v15, %v1903_v61  ;;  %v365_v3 = vsub.f32 %v1860_v17, %v1903_v61 }
 0x202   :  { %v366_v4 = vsub.f32 %v1863_v20, %v1903_v61  ;;  %v367_v7 = vsub.f32 %v1866_v22, %v1903_v61  ;;  %v368_v10 = vsub.f32 %v1869_v24, %v1903_v61  ;;  %v369_v16 = vsub.f32 %v1872_v26, %v1903_v61 }
 0x203   :  { %v378_v1 = vmul.f32 %v362_v62, %v362_v62  ;;  %v379_v2 = vmul.f32 %v363_v63, %v363_v63  ;;  %v380_v5 = vmul.f32 %v364_v0, %v364_v0  ;;  %v381_v8 = vmul.f32 %v365_v3, %v365_v3  ;;  %v496_v63 = vld [vmem:[#allocation7 + $0x50] sm:$0xff] }
 0x204   :  { %v382_v11 = vmul.f32 %v366_v4, %v366_v4  ;;  %v383_v18 = vmul.f32 %v367_v7, %v367_v7  ;;  %v370_v21 = vsub.f32 %v1875_v29, %v1903_v61  ;;  %v384_v23 = vmul.f32 %v368_v10, %v368_v10  ;;  %507 = vmatpush.msrb.mxu2 %v496_v63  ;;  %v493_v7 = vld [vmem:[#allocation7 + $0x38] sm:$0xff] }
 0x205   :  { %v394_v6 = vadd.f32 %v379_v2, %v378_v1  ;;  %v371_v27 = vsub.f32 %v1878_v31, %v1903_v61  ;;  %v385_v28 = vmul.f32 %v369_v16, %v369_v16  ;;  %v372_v32 = vsub.f32 %v1881_v33, %v1903_v61  ;;  %v495_v2 = vld [vmem:[#allocation7 + $0x48] sm:$0xff]  ;;  %v490_v16 = vld [vmem:[#allocation7 + $0x20] sm:$0xff] }
 0x206   :  { %v386_v34 = vmul.f32 %v370_v21, %v370_v21  ;;  %v373_v38 = vsub.f32 %v1884_v36, %v1903_v61  ;;  %v374_v45 = vsub.f32 %v1887_v39, %v1903_v61  ;;  %v375_v50 = vsub.f32 %v1890_v42, %v1903_v61  ;;  %508 = vmatpush.msrb.mxu2 %v495_v2 }
 0x207   :  { %v395_v9 = vadd.f32 %v394_v6, %v380_v5  ;;  %v387_v40 = vmul.f32 %v371_v27, %v371_v27  ;;  %v388_v46 = vmul.f32 %v372_v32, %v372_v32  ;;  %v376_v54 = vsub.f32 %v1893_v44, %v1903_v61  ;;  %v494_v5 = vld [vmem:[#allocation7 + $0x40] sm:$0xff] }
 0x208   :  { %v389_v51 = vmul.f32 %v373_v38, %v373_v38  ;;  %v390_v55 = vmul.f32 %v374_v45, %v374_v45  ;;  %v377_v58 = vsub.f32 %v1897_v49, %v1903_v61  ;;  %v391_v60 = vmul.f32 %v375_v50, %v375_v50  ;;  %509 = vmatpush.msrb.mxu2 %v494_v5 }
 0x209   :  { %v396_v12 = vadd.f32 %v395_v9, %v381_v8  ;;  %v392_v0 = vmul.f32 %v376_v54, %v376_v54  ;;  %v492_v9 = vld [vmem:[#allocation7 + $0x30] sm:$0xff] }
 0x20a   :  { %v393_v3 = vmul.f32 %v377_v58, %v377_v58  ;;  %510 = vmatpush.msrb.mxu2 %v493_v7 }
 0x20b   :  { %v397_v19 = vadd.f32 %v396_v12, %v382_v11  ;;  %v491_v11 = vld [vmem:[#allocation7 + $0x28] sm:$0xff] }
 0x20c   :  { %511 = vmatpush.msrb.mxu2 %v492_v9 }
 0x20d   :  { %v398_v25 = vadd.f32 %v397_v19, %v383_v18  ;;  %v489_v19 = vld [vmem:[#allocation7 + $0x18] sm:$0xff] }
 0x20e   :  { %512 = vmatpush.msrb.mxu2 %v491_v11 }
 0x20f   :  { %v399_v30 = vadd.f32 %v398_v25, %v384_v23  ;;  %v488_v23 = vld [vmem:[#allocation7 + $0x10] sm:$0xff]  ;;  %v487_v25 = vld [vmem:[#allocation7 + $0x8] sm:$0xff] }
 0x210   :  { %513 = vmatpush.msrb.mxu2 %v490_v16 }
 0x211   :  { %v400_v35 = vadd.f32 %v399_v30, %v385_v28  ;;  %v486_v28 = vld [vmem:[#allocation7] sm:$0xff] }
 0x212   :  { %514 = vmatpush.msrb.mxu2 %v489_v19 }
 0x213   :  { %v401_v41 = vadd.f32 %v400_v35, %v386_v34 }
 0x214   :  { %515 = vmatpush.msrb.mxu2 %v488_v23 }
 0x215   :  { %v402_v47 = vadd.f32 %v401_v41, %v387_v40  ;;  %v416_v41 = vld [vmem:[%s2225_s9] sm:$0x1] }
 0x216   :  { %516 = vmatpush.msrb.mxu2 %v487_v25 }
 0x217   :  { %v403_v52 = vadd.f32 %v402_v47, %v388_v46 }
 0x218   :  { %517 = vmatpush.msrb.mxu2 %v486_v28 }
 0x219   :  { %v404_v56 = vadd.f32 %v403_v52, %v389_v51 }
 0x21b   :  { %v405_v62 = vadd.f32 %v404_v56, %v390_v55 }
 0x21d   :  { %v406_v1 = vadd.f32 %v405_v62, %v391_v60 }
 0x21f   :  { %v407_v4 = vadd.f32 %v406_v1, %v392_v0 }
 0x221   :  { %v408_v6 = vadd.f32 %v407_v4, %v393_v3 }
 0x223   :  { %v409_v8 = vrot.slane %v408_v6, 4 }
 0x225   :  { %v410_v10 = vadd.f32 %v409_v8, %v408_v6 }
 0x227   :  { %v411_v12 = vrot.slane %v410_v10, 2 }
 0x229   :  { %v412_v18 = vadd.f32 %v411_v12, %v410_v10 }
 0x22b   :  { %v413_v21 = vrot.slane %v412_v18, 1 }
 0x22d   :  { %v414_v27 = vadd.f32 %v413_v21, %v412_v18 }
 0x22f   :  { %v415_v30 = vmul.f32 %v414_v27, %v1900_v59  ;;  %v429_v59 = vld [vmem:[%s2226_s10] sm:$0x1] }
 0x231   :  { %v417_v32 = vadd.f32 1e-05, %v415_v30 }
 0x233   :  { %1483 = vrsqrt.f32 %v417_v32  ;;  %vm424_vm2 = vweird.f32 %v417_v32 }
 0x239   :  { %v1484_v34 = vpop.eup %1483 }
 0x23a   :  { %v419_v35 = vmul.f32 %v1484_v34, %v417_v32  ;;  %vm425_vm1 = vweird.f32 %v1484_v34 }
 0x23b   :  { %vm426_vm3 = vmor %vm424_vm2, %vm425_vm1 }
 0x23c   :  { %v420_v37 = vmul.f32 %v1484_v34, %v419_v35 }
 0x23e   :  { %v421_v38 = vmul.f32 0.5, %v420_v37 }
 0x240   :  { %v422_v40 = vsub.f32 1.5, %v421_v38 }
 0x242   :  { %v423_v43 = vmul.f32 %v1484_v34, %v422_v40 }
 0x244   :  { %v427_v45 = vsel %vm426_vm3, %v1484_v34, %v423_v43 }
 0x245   :  { %v428_v46 = vmul.f32 %v427_v45, %v416_v41 }
 0x247   :  { %v430_v47 = vmul.f32 %v428_v46, %v1903_v61  ;;  %v433_v48 = vperm.slane %v428_v46, 0 }
 0x249   :  { %v431_v50 = vsub.f32 %v429_v59, %v430_v47  ;;  %v435_v52 = vmul.f32 %v433_v48, %v1854_v14  ;;  %v443_v54 = vmul.f32 %v433_v48, %v1875_v29  ;;  %v444_v56 = vmul.f32 %v433_v48, %v1878_v31 }
 0x24a   :  { %v445_v57 = vmul.f32 %v433_v48, %v1881_v33  ;;  %v446_v58 = vmul.f32 %v433_v48, %v1884_v36  ;;  %v436_v60 = vmul.f32 %v433_v48, %v1852_v13  ;;  %v447_v62 = vmul.f32 %v433_v48, %v1887_v39 }
 0x24b   :  { %v452_v51 = vperm.slane %v431_v50, 0  ;;  %v448_v61 = vmul.f32 %v433_v48, %v1890_v42  ;;  %v449_v3 = vmul.f32 %v433_v48, %v1893_v44  ;;  %v450_v31 = vmul.f32 %v433_v48, %v1897_v49 }
 0x24c   :  { %v437_v13 = vmul.f32 %v433_v48, %v1856_v15  ;;  %v438_v6 = vmul.f32 %v433_v48, %v1860_v17  ;;  %v439_v9 = vmul.f32 %v433_v48, %v1863_v20  ;;  %v440_v49 = vmul.f32 %v433_v48, %v1866_v22 }
 0x24d   :  { %v454_v53 = vadd.f32 %v452_v51, %v435_v52  ;;  %v462_v63 = vadd.f32 %v452_v51, %v443_v54  ;;  %v463_v0 = vadd.f32 %v452_v51, %v444_v56  ;;  %v464_v14 = vadd.f32 %v452_v51, %v445_v57  ;;  %v567_v52 = vld [vmem:[%s2219_s3] sm:$0xff]  ;;  %v569_v54 = vld [vmem:[%s2219_s3 + $0x10] sm:$0xff]  ;;  %v572_v57 = vld [vmem:[%s2219_s3 + $0x28] sm:$0xff] }
 0x24e   :  { %v465_v1 = vadd.f32 %v452_v51, %v446_v58  ;;  %v466_v2 = vadd.f32 %v452_v51, %v447_v62  ;;  %v467_v29 = vadd.f32 %v452_v51, %v448_v61  ;;  %v455_v33 = vadd.f32 %v452_v51, %v436_v60  ;;  %v571_v56 = vld [vmem:[%s2219_s3 + $0x20] sm:$0xff]  ;;  %v573_v58 = vld [vmem:[%s2219_s3 + $0x30] sm:$0xff]  ;;  %v574_v60 = vld [vmem:[%s2219_s3 + $0x38] sm:$0xff] }
 0x24f   :  { %v470_v55 = vmax.f32 %v454_v53, 0.0  ;;  %v468_v4 = vadd.f32 %v452_v51, %v449_v3  ;;  %v469_v36 = vadd.f32 %v452_v51, %v450_v31  ;;  %v456_v39 = vadd.f32 %v452_v51, %v437_v13  ;;  %v568_v53 = vld [vmem:[%s2219_s3 + $0x8] sm:$0xff]  ;;  %v654_v61 = vld [vmem:[%s2238_s1] sm:$0xff]  ;;  %v577_v3 = vld [vmem:[%s2219_s3 + $0x50] sm:$0xff] }
 0x250   :  { %v471_v5 = vmax.f32 %v455_v33, 0.0  ;;  %v457_v7 = vadd.f32 %v452_v51, %v438_v6  ;;  %v458_v44 = vadd.f32 %v452_v51, %v439_v9  ;;  %v459_v11 = vadd.f32 %v452_v51, %v440_v49  ;;  %v769_v31 = vld [vmem:[%s2239_s22 + $0x18] sm:$0xff]  ;;  %v770_v33 = vld [vmem:[%s2239_s22 + $0x20] sm:$0xff]  ;;  %v580_v6 = vld [vmem:[%s2219_s3 + $0x68] sm:$0xff] }
 0x251   :  { %518 = vmatmul.f32.vlgmr.msrb.gmra.mxu2 %v470_v55  ;;  %v472_v42 = vmax.f32 %v456_v39, 0.0  ;;  %v441_v15 = vmul.f32 %v433_v48, %v1869_v24  ;;  %v442_v17 = vmul.f32 %v433_v48, %v1872_v26  ;;  %v478_v23 = vmax.f32 %v462_v63, 0.0  ;;  %v570_v55 = vld [vmem:[%s2219_s3 + $0x18] sm:$0xff]  ;;  %v575_v63 = vld [vmem:[%s2219_s3 + $0x40] sm:$0xff]  ;;  %v772_v39 = vld [vmem:[%s2239_s22 + $0x30] sm:$0xff] }
 0x252   :  { %v473_v8 = vmax.f32 %v457_v7, 0.0  ;;  %v474_v10 = vmax.f32 %v458_v44, 0.0  ;;  %v475_v12 = vmax.f32 %v459_v11, 0.0  ;;  %v479_v20 = vmax.f32 %v463_v0, 0.0  ;;  %v655_v0 = vld [vmem:[%s2238_s1 + $0x8] sm:$0xff]  ;;  %v579_v13 = vld [vmem:[%s2219_s3 + $0x60] sm:$0xff] }
 0x253   :  { %v460_v16 = vadd.f32 %v452_v51, %v441_v15  ;;  %v461_v19 = vadd.f32 %v452_v51, %v442_v17  ;;  %v480_v25 = vmax.f32 %v464_v14, 0.0  ;;  %v481_v22 = vmax.f32 %v465_v1, 0.0  ;;  %v766_v14 = vld [vmem:[%s2239_s22] sm:$0xff]  ;;  %v576_v1 = vld [vmem:[%s2219_s3 + $0x48] sm:$0xff]  ;;  %v656_v7 = vld [vmem:[%s2238_s1 + $0x10] sm:$0xff] }
 0x254   :  { %v482_v27 = vmax.f32 %v466_v2, 0.0  ;;  %v483_v28 = vmax.f32 %v467_v29, 0.0  ;;  %v484_v24 = vmax.f32 %v468_v4, 0.0  ;;  %v485_v30 = vmax.f32 %v469_v36, 0.0  ;;  %v767_v2 = vld [vmem:[%s2239_s22 + $0x8] sm:$0xff]  ;;  %v657_v29 = vld [vmem:[%s2238_s1 + $0x18] sm:$0xff] }
 0x255   :  { %v476_v18 = vmax.f32 %v460_v16, 0.0  ;;  %v477_v21 = vmax.f32 %v461_v19, 0.0  ;;  %v1672_v62 = vmov 0   ;;  %v578_v4 = vld [vmem:[%s2219_s3 + $0x58] sm:$0xff]  ;;  %v659_v36 = vld [vmem:[%s2238_s1 + $0x28] sm:$0xff]  ;;  %v581_v44 = vld [vmem:[%s2219_s3 + $0x70] sm:$0xff] }
 0x256   :  { %1473 = vset.pattern.permute.xlu0 %v1672_v62  ;;  %1474 = vset.pattern.permute.xlu1 %v1672_v62  ;;  %v663_v9 = vld [vmem:[%s2238_s1 + $0x48] sm:$0xff]  ;;  %v776_v11 = vld [vmem:[%s2239_s22 + $0x50] sm:$0xff]  ;;  %v658_v15 = vld [vmem:[%s2238_s1 + $0x20] sm:$0xff] }
 0x257   :  { %671 = vperm.xlu0 %1473, %v654_v61   ;;  %1475 = vset.pattern.permute.xlu2 %v1672_v62  ;;  %v775_v49 = vld [vmem:[%s2239_s22 + $0x48] sm:$0xff]  ;;  %v665_v16 = vld [vmem:[%s2238_s1 + $0x58] sm:$0xff]  ;;  %v778_v19 = vld [vmem:[%s2239_s22 + $0x60] sm:$0xff] }
 0x258   :  { %674 = vperm.xlu1 %1474, %v655_v0   ;;  %677 = vperm.xlu2 %1475, %v656_v7   ;;  %v771_v17 = vld [vmem:[%s2239_s22 + $0x28] sm:$0xff] }
 0x259   :  { %521 = vmatmul.f32.gmra.mxu2 %v471_v5  ;;  %v660_v5 = vld [vmem:[%s2238_s1 + $0x30] sm:$0xff] }
 0x25f   :  { %783 = vperm.xlu0 %1473, %v766_v14  }
 0x260   :  { %786 = vperm.xlu1 %1474, %v767_v2  }
 0x261   :  { %524 = vmatmul.f32.gmra.mxu2 %v472_v42  ;;  %v773_v42 = vld [vmem:[%s2239_s22 + $0x38] sm:$0xff] }
 0x267   :  { %680 = vperm.xlu0 %1473, %v657_v29   ;;  %v652_v29 = vlaneseq }
 0x268   :  { %792 = vperm.xlu1 %1474, %v769_v31  }
 0x269   :  { %527 = vmatmul.f32.gmra.mxu2 %v473_v8  ;;  %v662_v8 = vld [vmem:[%s2238_s1 + $0x40] sm:$0xff] }
 0x26f   :  { %795 = vperm.xlu0 %1473, %v770_v33   ;;  %v2115_v33 = vand.u32 127, %v652_v29 }
 0x270   :  { %686 = vperm.xlu1 %1474, %v659_v36  }
 0x271   :  { %530 = vmatmul.f32.gmra.mxu2 %v474_v10  ;;  %v768_v10 = vld [vmem:[%s2239_s22 + $0x10] sm:$0xff] }
 0x272   :  { %789 = vperm.xlu2 %1475, %v768_v10  }
 0x277   :  { %689 = vperm.xlu0 %1473, %v660_v5  }
 0x278   :  { %801 = vperm.xlu1 %1474, %v772_v39   ;;  %v1673_v39 = vmov 1.0  }
 0x279   :  { %533 = vmatmul.f32.gmra.mxu2 %v475_v12  ;;  %v582_v12 = vld [vmem:[%s2219_s3 + $0x78] sm:$0xff] }
 0x27a   :  { %683 = vperm.xlu2 %1475, %v658_v15  }
 0x27f   :  { %804 = vperm.xlu0 %1473, %v773_v42  }
 0x280   :  { %695 = vperm.xlu1 %1474, %v662_v8  }
 0x281   :  { %536 = vmatmul.f32.gmra.mxu2 %v476_v18  ;;  %v666_v18 = vld [vmem:[%s2238_s1 + $0x60] sm:$0xff] }
 0x282   :  { %798 = vperm.xlu2 %1475, %v771_v17  }
 0x287   :  { %698 = vperm.xlu0 %1473, %v663_v9  }
 0x288   :  { %810 = vperm.xlu1 %1474, %v775_v49  }
 0x289   :  { %539 = vmatmul.f32.gmra.mxu2 %v477_v21  ;;  %v779_v21 = vld [vmem:[%s2239_s22 + $0x68] sm:$0xff] }
 0x28f   :  { %813 = vperm.xlu0 %1473, %v776_v11  }
 0x290   :  { %704 = vperm.xlu1 %1474, %v665_v16  }
 0x291   :  { %542 = vmatmul.f32.gmra.mxu2 %v478_v23 }
 0x297   :  { %707 = vperm.xlu0 %1473, %v666_v18  }
 0x298   :  { %819 = vperm.xlu1 %1474, %v778_v19  }
 0x299   :  { %545 = vmatmul.f32.gmra.mxu2 %v479_v20  ;;  %v661_v20 = vld [vmem:[%s2238_s1 + $0x38] sm:$0xff] }
 0x29a   :  { %692 = vperm.xlu2 %1475, %v661_v20   ;;  %v1037_v20 = vld [vmem:[#allocation8 + $0x68] sm:$0xff] }
 0x29f   :  { %822 = vperm.xlu0 %1473, %v779_v21   ;;  %v1039_v21 = vld [vmem:[#allocation8 + $0x78] sm:$0xff] }
 0x2a0   :  { %1044 = vmatpush.msra.mxu2 %v1039_v21 }
 0x2a1   :  { %548 = vmatmul.f32.gmra.mxu2 %v480_v25  ;;  %v668_v25 = vld [vmem:[%s2238_s1 + $0x70] sm:$0xff] }
 0x2a2   :  { %713 = vperm.xlu1 %1474, %v668_v25  }
 0x2a9   :  { %551 = vmatmul.f32.gmra.mxu2 %v481_v22  ;;  %v669_v22 = vld [vmem:[%s2238_s1 + $0x78] sm:$0xff] }
 0x2aa   :  { %716 = vperm.xlu0 %1473, %v669_v22   ;;  %v1036_v22 = vld [vmem:[#allocation8 + $0x60] sm:$0xff] }
 0x2b1   :  { %554 = vmatmul.f32.gmra.mxu2 %v482_v27 }
 0x2b2   :  { %v678_v42 = vpop.permute.xlu2 %677 }
 0x2b3   :  { %vm720_vm8 = vcmp.eq.s32.totalorder %v2115_v33, %v678_v42 }
 0x2b9   :  { %557 = vmatmul.f32.gmra.mxu2 %v483_v28  ;;  %v774_v28 = vld [vmem:[%s2239_s22 + $0x40] sm:$0xff] }
 0x2ba   :  { %807 = vperm.xlu2 %1475, %v774_v28   ;;  %v1035_v28 = vld [vmem:[#allocation8 + $0x58] sm:$0xff] }
 0x2c1   :  { %560 = vmatmul.f32.gmra.mxu2 %v484_v24  ;;  %v781_v24 = vld [vmem:[%s2239_s22 + $0x78] sm:$0xff] }
 0x2c2   :  { %828 = vperm.xlu1 %1474, %v781_v24   ;;  %v1034_v24 = vld [vmem:[#allocation8 + $0x50] sm:$0xff] }
 0x2c9   :  { %563 = vmatmul.f32.gmra.mxu2 %v485_v30 }
 0x2ca   :  { %v675_v36 = vpop.permute.xlu1 %674 }
 0x2cb   :  { %vm719_vm6 = vcmp.eq.s32.totalorder %v2115_v33, %v675_v36 }
 0x2cc   :  { %v790_v7 = vpop.permute.xlu2 %789 }
 0x2cd   :  { %vm832_vm9 = vcmp.eq.s32.totalorder %v2115_v33, %v790_v7 }
 0x2d4   :  { %v519_v26 = vpop.f32.mrf.mxu2 }
 0x2dc   :  { %v522_v32 = vpop.f32.mrf.mxu2 }
 0x2e4   :  { %v525_v34 = vpop.f32.mrf.mxu2 }
 0x2ec   :  { %v528_v35 = vpop.f32.mrf.mxu2 }
 0x2f4   :  { %v531_v37 = vpop.f32.mrf.mxu2 }
 0x2fc   :  { %v534_v38 = vpop.f32.mrf.mxu2 }
 0x304   :  { %v537_v40 = vpop.f32.mrf.mxu2 }
 0x30c   :  { %v540_v41 = vpop.f32.mrf.mxu2 }
 0x314   :  { %v543_v43 = vpop.f32.mrf.mxu2 }
 0x31c   :  { %v546_v45 = vpop.f32.mrf.mxu2 }
 0x324   :  { %v549_v46 = vpop.f32.mrf.mxu2 }
 0x32c   :  { %v552_v59 = vpop.f32.mrf.mxu2 }
 0x334   :  { %v555_v47 = vpop.f32.mrf.mxu2 }
 0x33c   :  { %v558_v48 = vpop.f32.mrf.mxu2 }
 0x344   :  { %v561_v50 = vpop.f32.mrf.mxu2 }
 0x34c   :  { %v564_v51 = vpop.f32.mrf.mxu2 }
 0x34d   :  { %587 = vmatpush.msrb.mxu3 %v564_v51 }
 0x34f   :  { %588 = vmatpush.msrb.mxu3 %v561_v50 }
 0x351   :  { %589 = vmatpush.msrb.mxu3 %v558_v48 }
 0x353   :  { %590 = vmatpush.msrb.mxu3 %v555_v47 }
 0x355   :  { %591 = vmatpush.msrb.mxu3 %v552_v59 }
 0x357   :  { %592 = vmatpush.msrb.mxu3 %v549_v46 }
 0x359   :  { %593 = vmatpush.msrb.mxu3 %v546_v45 }
 0x35b   :  { %594 = vmatpush.msrb.mxu3 %v543_v43 }
 0x35d   :  { %595 = vmatpush.msrb.mxu3 %v540_v41 }
 0x35f   :  { %596 = vmatpush.msrb.mxu3 %v537_v40  ;;  %v780_v40 = vld [vmem:[%s2239_s22 + $0x70] sm:$0xff] }
 0x361   :  { %597 = vmatpush.msrb.mxu3 %v534_v38 }
 0x363   :  { %598 = vmatpush.msrb.mxu3 %v531_v37  ;;  %v667_v37 = vld [vmem:[%s2238_s1 + $0x68] sm:$0xff] }
 0x365   :  { %599 = vmatpush.msrb.mxu3 %v528_v35 }
 0x367   :  { %600 = vmatpush.msrb.mxu3 %v525_v34  ;;  %v777_v34 = vld [vmem:[%s2239_s22 + $0x58] sm:$0xff] }
 0x369   :  { %601 = vmatpush.msrb.mxu3 %v522_v32 }
 0x36b   :  { %602 = vmatpush.msrb.mxu3 %v519_v26  ;;  %v664_v26 = vld [vmem:[%s2238_s1 + $0x50] sm:$0xff] }
 0x36c   :  { %603 = vmatmul.f32.vlgmr.msrb.gmra.mxu3 %v567_v52  ;;  %701 = vperm.xlu2 %1475, %v664_v26   ;;  %v1477_v52 = vld [vmem:[%s2224_s8] ss:$0 sm:$0xff] }
 0x374   :  { %606 = vmatmul.f32.gmra.mxu3 %v568_v53  ;;  %816 = vperm.xlu2 %1475, %v777_v34  }
 0x37c   :  { %609 = vmatmul.f32.gmra.mxu3 %v569_v54  ;;  %710 = vperm.xlu2 %1475, %v667_v37   ;;  %v1030_v37 = vld [vmem:[#allocation8 + $0x30] sm:$0xff] }
 0x384   :  { %612 = vmatmul.f32.gmra.mxu3 %v570_v55  ;;  %825 = vperm.xlu2 %1475, %v780_v40  }
 0x38c   :  { %615 = vmatmul.f32.gmra.mxu3 %v571_v56 }
 0x394   :  { %618 = vmatmul.f32.gmra.mxu3 %v572_v57 }
 0x39c   :  { %621 = vmatmul.f32.gmra.mxu3 %v573_v58 }
 0x3a4   :  { %624 = vmatmul.f32.gmra.mxu3 %v574_v60 }
 0x3ac   :  { %627 = vmatmul.f32.gmra.mxu3 %v575_v63 }
 0x3b4   :  { %630 = vmatmul.f32.gmra.mxu3 %v576_v1  ;;  %v672_v1 = vpop.permute.xlu0 %671 }
 0x3b5   :  { %vm718_vm4 = vcmp.eq.s32.totalorder %v2115_v33, %v672_v1 }
 0x3bc   :  { %633 = vmatmul.f32.gmra.mxu3 %v577_v3 }
 0x3c4   :  { %636 = vmatmul.f32.gmra.mxu3 %v578_v4 }
 0x3cc   :  { %639 = vmatmul.f32.gmra.mxu3 %v579_v13  ;;  %v784_v13 = vpop.permute.xlu0 %783 }
 0x3cd   :  { %vm830_vm5 = vcmp.eq.s32.totalorder %v2115_v33, %v784_v13 }
 0x3d4   :  { %642 = vmatmul.f32.gmra.mxu3 %v580_v6  ;;  %v787_v6 = vpop.permute.xlu1 %786  ;;  %v681_v8 = vpop.permute.xlu0 %680 }
 0x3d5   :  { %vm831_vm7 = vcmp.eq.s32.totalorder %v2115_v33, %v787_v6  ;;  %vm721_vm11 = vcmp.eq.s32.totalorder %v2115_v33, %v681_v8 }
 0x3dc   :  { %645 = vmatmul.f32.gmra.mxu3 %v581_v44  ;;  %v793_v9 = vpop.permute.xlu1 %792  ;;  %v684_v44 = vpop.permute.xlu2 %683 }
 0x3dd   :  { %vm833_vm10 = vcmp.eq.s32.totalorder %v2115_v33, %v793_v9  ;;  %v796_v10 = vpop.permute.xlu0 %795  ;;  %vm722_vm12 = vcmp.eq.s32.totalorder %v2115_v33, %v684_v44 }
 0x3de   :  { %vm834_vm13 = vcmp.eq.s32.totalorder %v2115_v33, %v796_v10 }
 0x3e4   :  { %648 = vmatmul.f32.gmra.mxu3 %v582_v12  ;;  %v687_v49 = vpop.permute.xlu1 %686  ;;  %v799_v11 = vpop.permute.xlu2 %798 }
 0x3e5   :  { %vm835_vm14 = vcmp.eq.s32.totalorder %v2115_v33, %v799_v11  ;;  %vm723_vm15 = vcmp.eq.s32.totalorder %v2115_v33, %v687_v49  ;;  %v690_v12 = vpop.permute.xlu0 %689 }
 0x3e6   :  { %vm724_vm0 = vcmp.eq.s32.totalorder %v2115_v33, %v690_v12 }
 0x3ec   :  { %v802_v15 = vpop.permute.xlu1 %801  ;;  %v693_v16 = vpop.permute.xlu2 %692 }
 0x3ed   :  { %vm836_vm1 = vcmp.eq.s32.totalorder %v2115_v33, %v802_v15  ;;  %v805_v18 = vpop.permute.xlu0 %804  ;;  %vm725_vm3 = vcmp.eq.s32.totalorder %v2115_v33, %v693_v16  ;;  %v1140_v16 = vld [vmem:[#allocation10 + $0x78] sm:$0xff] }
 0x3ee   :  { %vm837_vm2 = vcmp.eq.s32.totalorder %v2115_v33, %v805_v18  ;;  %v1139_v18 = vld [vmem:[#allocation10 + $0x70] sm:$0xff]  ;;  %1145 = vmatpush.msra.mxu3 %v1140_v16 }
 0x3ef   :  { %v2078_v23 = vpop.f32.mrf.mxu3 }
 0x3f0   :  { %v605_v5 = vadd.f32 %v1477_v52, %v2078_v23  ;;  %v1038_v23 = vld [vmem:[#allocation8 + $0x70] sm:$0xff]  ;;  %1146 = vmatpush.msra.mxu3 %v1139_v18  ;;  %v1241_v18 = vld [vmem:[#allocation11 + $0x78] sm:$0xff] }
 0x3f1   :  { %1045 = vmatpush.msra.mxu2 %v1038_v23  ;;  %v1138_v23 = vld [vmem:[#allocation10 + $0x68] sm:$0xff] }
 0x3f2   :  { %1147 = vmatpush.msra.mxu3 %v1138_v23  ;;  %v1240_v23 = vld [vmem:[#allocation11 + $0x70] sm:$0xff] }
 0x3f3   :  { %1046 = vmatpush.msra.mxu2 %v1037_v20  ;;  %v1137_v20 = vld [vmem:[#allocation10 + $0x60] sm:$0xff] }
 0x3f4   :  { %v696_v17 = vpop.permute.xlu1 %695  ;;  %v808_v19 = vpop.permute.xlu2 %807  ;;  %1148 = vmatpush.msra.mxu3 %v1137_v20  ;;  %v1239_v20 = vld [vmem:[#allocation11 + $0x68] sm:$0xff] }
 0x3f5   :  { %v699_v25 = vpop.permute.xlu0 %698  ;;  %1047 = vmatpush.msra.mxu2 %v1036_v22  ;;  %v1135_v22 = vld [vmem:[#allocation10 + $0x50] sm:$0xff] }
 0x3f7   :  { %v2089_v27 = vpop.f32.mrf.mxu3  ;;  %1048 = vmatpush.msra.mxu2 %v1035_v28 }
 0x3f8   :  { %v608_v4 = vadd.f32 %v1477_v52, %v2089_v27 }
 0x3f9   :  { %1049 = vmatpush.msra.mxu2 %v1034_v24 }
 0x3fc   :  { %v811_v27 = vpop.permute.xlu1 %810  ;;  %v702_v26 = vpop.permute.xlu2 %701 }
 0x3fd   :  { %v814_v34 = vpop.permute.xlu0 %813 }
 0x3ff   :  { %v2097_v30 = vpop.f32.mrf.mxu3 }
 0x400   :  { %v611_v31 = vadd.f32 %v1477_v52, %v2097_v30  ;;  %v1033_v30 = vld [vmem:[#allocation8 + $0x48] sm:$0xff] }
 0x401   :  { %1050 = vmatpush.msra.mxu2 %v1033_v30  ;;  %v1134_v30 = vld [vmem:[#allocation10 + $0x48] sm:$0xff] }
 0x404   :  { %v705_v40 = vpop.permute.xlu1 %704 }
 0x407   :  { %v613_v32 = vpop.f32.mrf.mxu3 }
 0x408   :  { %v614_v3 = vadd.f32 %v1477_v52, %v613_v32  ;;  %v1032_v32 = vld [vmem:[#allocation8 + $0x40] sm:$0xff] }
 0x409   :  { %1051 = vmatpush.msra.mxu2 %v1032_v32  ;;  %v1132_v32 = vld [vmem:[#allocation10 + $0x38] sm:$0xff] }
 0x40f   :  { %v616_v35 = vpop.f32.mrf.mxu3 }
 0x410   :  { %v617_v2 = vadd.f32 %v1477_v52, %v616_v35  ;;  %v1031_v35 = vld [vmem:[#allocation8 + $0x38] sm:$0xff] }
 0x411   :  { %1052 = vmatpush.msra.mxu2 %v1031_v35  ;;  %v1130_v35 = vld [vmem:[#allocation10 + $0x28] sm:$0xff] }
 0x413   :  { %1053 = vmatpush.msra.mxu2 %v1030_v37 }
 0x417   :  { %v619_v38 = vpop.f32.mrf.mxu3 }
 0x418   :  { %v620_v14 = vadd.f32 %v1477_v52, %v619_v38  ;;  %v1029_v38 = vld [vmem:[#allocation8 + $0x28] sm:$0xff] }
 0x419   :  { %1054 = vmatpush.msra.mxu2 %v1029_v38 }
 0x41f   :  { %v622_v41 = vpop.f32.mrf.mxu3 }
 0x420   :  { %v623_v0 = vadd.f32 %v1477_v52, %v622_v41  ;;  %v1028_v41 = vld [vmem:[#allocation8 + $0x20] sm:$0xff] }
 0x421   :  { %1055 = vmatpush.msra.mxu2 %v1028_v41  ;;  %v1129_v41 = vld [vmem:[#allocation10 + $0x20] sm:$0xff] }
 0x427   :  { %v625_v43 = vpop.f32.mrf.mxu3 }
 0x428   :  { %v626_v63 = vadd.f32 %v1477_v52, %v625_v43  ;;  %v817_v43 = vpop.permute.xlu2 %816 }
 0x42f   :  { %v628_v45 = vpop.f32.mrf.mxu3 }
 0x430   :  { %v629_v61 = vadd.f32 %v1477_v52, %v628_v45  ;;  %v1027_v45 = vld [vmem:[#allocation8 + $0x18] sm:$0xff] }
 0x431   :  { %1056 = vmatpush.msra.mxu2 %v1027_v45 }
 0x437   :  { %v631_v46 = vpop.f32.mrf.mxu3 }
 0x438   :  { %v632_v62 = vadd.f32 %v1477_v52, %v631_v46  ;;  %v1026_v46 = vld [vmem:[#allocation8 + $0x10] sm:$0xff] }
 0x439   :  { %1057 = vmatpush.msra.mxu2 %v1026_v46 }
 0x43f   :  { %v634_v59 = vpop.f32.mrf.mxu3 }
 0x440   :  { %v635_v60 = vadd.f32 %v1477_v52, %v634_v59  ;;  %v708_v59 = vpop.permute.xlu0 %707 }
 0x447   :  { %v637_v47 = vpop.f32.mrf.mxu3 }
 0x448   :  { %v638_v58 = vadd.f32 %v1477_v52, %v637_v47  ;;  %v820_v47 = vpop.permute.xlu1 %819 }
 0x44f   :  { %v640_v48 = vpop.f32.mrf.mxu3 }
 0x450   :  { %v641_v57 = vadd.f32 %v1477_v52, %v640_v48  ;;  %v1025_v48 = vld [vmem:[#allocation8 + $0x8] sm:$0xff] }
 0x451   :  { %1058 = vmatpush.msra.mxu2 %v1025_v48  ;;  %v1126_v48 = vld [vmem:[#allocation10 + $0x8] sm:$0xff] }
 0x457   :  { %v643_v50 = vpop.f32.mrf.mxu3 }
 0x458   :  { %v644_v56 = vadd.f32 %v1477_v52, %v643_v50  ;;  %v1024_v50 = vld [vmem:[#allocation8] sm:$0xff] }
 0x459   :  { %1059 = vmatpush.msra.mxu2 %v1024_v50  ;;  %v1125_v50 = vld [vmem:[#allocation10] sm:$0xff] }
 0x45f   :  { %v646_v51 = vpop.f32.mrf.mxu3 }
 0x460   :  { %v647_v55 = vadd.f32 %v1477_v52, %v646_v51  ;;  %v711_v51 = vpop.permute.xlu2 %710 }
 0x467   :  { %v649_v53 = vpop.f32.mrf.mxu3 }
 0x468   :  { %v650_v54 = vadd.f32 %v1477_v52, %v649_v53  ;;  %v823_v52 = vpop.permute.xlu0 %822  ;;  %v714_v53 = vpop.permute.xlu1 %713 }
 0x46a   :  { %878 = vmatpush.msrb.mxu0 %v650_v54  ;;  %943 = vmatpush.msra.mxu1 %v650_v54  ;;  %v826_v54 = vpop.permute.xlu2 %825 }
 0x46c   :  { %879 = vmatpush.msrb.mxu0 %v647_v55  ;;  %944 = vmatpush.msra.mxu1 %v647_v55 }
 0x46e   :  { %880 = vmatpush.msrb.mxu0 %v644_v56  ;;  %945 = vmatpush.msra.mxu1 %v644_v56 }
 0x470   :  { %881 = vmatpush.msrb.mxu0 %v641_v57  ;;  %946 = vmatpush.msra.mxu1 %v641_v57  ;;  %v717_v55 = vpop.permute.xlu0 %716  ;;  %v829_v56 = vpop.permute.xlu1 %828 }
 0x472   :  { %882 = vmatpush.msrb.mxu0 %v638_v58  ;;  %947 = vmatpush.msra.mxu1 %v638_v58 }
 0x474   :  { %883 = vmatpush.msrb.mxu0 %v635_v60  ;;  %948 = vmatpush.msra.mxu1 %v635_v60 }
 0x476   :  { %884 = vmatpush.msrb.mxu0 %v632_v62  ;;  %949 = vmatpush.msra.mxu1 %v632_v62 }
 0x478   :  { %885 = vmatpush.msrb.mxu0 %v629_v61  ;;  %950 = vmatpush.msra.mxu1 %v629_v61 }
 0x47a   :  { %886 = vmatpush.msrb.mxu0 %v626_v63  ;;  %951 = vmatpush.msra.mxu1 %v626_v63 }
 0x47c   :  { %887 = vmatpush.msrb.mxu0 %v623_v0  ;;  %952 = vmatpush.msra.mxu1 %v623_v0 }
 0x47e   :  { %888 = vmatpush.msrb.mxu0 %v620_v14  ;;  %953 = vmatpush.msra.mxu1 %v620_v14 }
 0x480   :  { %889 = vmatpush.msrb.mxu0 %v617_v2  ;;  %954 = vmatpush.msra.mxu1 %v617_v2 }
 0x482   :  { %890 = vmatpush.msrb.mxu0 %v614_v3  ;;  %955 = vmatpush.msra.mxu1 %v614_v3 }
 0x484   :  { %891 = vmatpush.msrb.mxu0 %v611_v31  ;;  %956 = vmatpush.msra.mxu1 %v611_v31 }
 0x486   :  { %892 = vmatpush.msrb.mxu0 %v608_v4  ;;  %957 = vmatpush.msra.mxu1 %v608_v4 }
 0x488   :  { %893 = vmatpush.msrb.mxu0 %v605_v5  ;;  %958 = vmatpush.msra.mxu1 %v605_v5 }
 0x489   :  { %1381 = vmatmul.msk.f32.vlgmr.msrb.gmra.mxu0 %vm718_vm4, %v1673_v39  ;;  %1397 = vmatmul.msk.f32.vlgmr.msra.gmra.mxu1 %vm830_vm5, %v1673_v39  ;;  %vm726_vm4 = vcmp.eq.s32.totalorder %v2115_v33, %v696_v17  ;;  %vm838_vm5 = vcmp.eq.s32.totalorder %v2115_v33, %v808_v19 }
 0x48a   :  { %1246 = vmatpush.msra.mxu0 %v1241_v18 }
 0x48c   :  { %1247 = vmatpush.msra.mxu0 %v1240_v23 }
 0x48e   :  { %1248 = vmatpush.msra.mxu0 %v1239_v20 }
 0x491   :  { %1382 = vmatmul.msk.f32.gmra.mxu0 %vm719_vm6, %v1673_v39  ;;  %1398 = vmatmul.msk.f32.gmra.mxu1 %vm831_vm7, %v1673_v39  ;;  %vm727_vm6 = vcmp.eq.s32.totalorder %v2115_v33, %v699_v25  ;;  %vm839_vm7 = vcmp.eq.s32.totalorder %v2115_v33, %v811_v27  ;;  %v1136_v25 = vld [vmem:[#allocation10 + $0x58] sm:$0xff] }
 0x492   :  { %1149 = vmatpush.msra.mxu3 %v1136_v25  ;;  %v1238_v25 = vld [vmem:[#allocation11 + $0x60] sm:$0xff] }
 0x493   :  { %1249 = vmatpush.msra.mxu0 %v1238_v25 }
 0x494   :  { %1150 = vmatpush.msra.mxu3 %v1135_v22  ;;  %v1237_v22 = vld [vmem:[#allocation11 + $0x58] sm:$0xff] }
 0x495   :  { %1250 = vmatpush.msra.mxu0 %v1237_v22 }
 0x496   :  { %1151 = vmatpush.msra.mxu3 %v1134_v30  ;;  %v1236_v30 = vld [vmem:[#allocation11 + $0x50] sm:$0xff] }
 0x497   :  { %1251 = vmatpush.msra.mxu0 %v1236_v30 }
 0x499   :  { %1383 = vmatmul.msk.f32.gmra.mxu0 %vm720_vm8, %v1673_v39  ;;  %1399 = vmatmul.msk.f32.gmra.mxu1 %vm832_vm9, %v1673_v39  ;;  %vm840_vm8 = vcmp.eq.s32.totalorder %v2115_v33, %v814_v34  ;;  %vm728_vm9 = vcmp.eq.s32.totalorder %v2115_v33, %v702_v26  ;;  %v1133_v26 = vld [vmem:[#allocation10 + $0x40] sm:$0xff]  ;;  %v1131_v34 = vld [vmem:[#allocation10 + $0x30] sm:$0xff] }
 0x49a   :  { %1152 = vmatpush.msra.mxu3 %v1133_v26  ;;  %v1235_v26 = vld [vmem:[#allocation11 + $0x48] sm:$0xff] }
 0x49b   :  { %1252 = vmatpush.msra.mxu0 %v1235_v26 }
 0x49c   :  { %1153 = vmatpush.msra.mxu3 %v1132_v32  ;;  %v1234_v32 = vld [vmem:[#allocation11 + $0x40] sm:$0xff] }
 0x49d   :  { %1253 = vmatpush.msra.mxu0 %v1234_v32 }
 0x49e   :  { %1154 = vmatpush.msra.mxu3 %v1131_v34  ;;  %v1233_v34 = vld [vmem:[#allocation11 + $0x38] sm:$0xff] }
 0x49f   :  { %1254 = vmatpush.msra.mxu0 %v1233_v34 }
 0x4a0   :  { %1155 = vmatpush.msra.mxu3 %v1130_v35 }
 0x4a1   :  { %1384 = vmatmul.msk.f32.gmra.mxu0 %vm721_vm11, %v1673_v39  ;;  %1400 = vmatmul.msk.f32.gmra.mxu1 %vm833_vm10, %v1673_v39  ;;  %vm729_vm10 = vcmp.eq.s32.totalorder %v2115_v33, %v705_v40  ;;  %vm841_vm11 = vcmp.eq.s32.totalorder %v2115_v33, %v817_v43  ;;  %v1128_v43 = vld [vmem:[#allocation10 + $0x18] sm:$0xff] }
 0x4a2   :  { %1156 = vmatpush.msra.mxu3 %v1129_v41  ;;  %v1231_v41 = vld [vmem:[#allocation11 + $0x28] sm:$0xff] }
 0x4a4   :  { %1157 = vmatpush.msra.mxu3 %v1128_v43  ;;  %v1230_v43 = vld [vmem:[#allocation11 + $0x20] sm:$0xff] }
 0x4a9   :  { %1385 = vmatmul.msk.f32.gmra.mxu0 %vm722_vm12, %v1673_v39  ;;  %1401 = vmatmul.msk.f32.gmra.mxu1 %vm834_vm13, %v1673_v39  ;;  %vm730_vm12 = vcmp.eq.s32.totalorder %v2115_v33, %v708_v59  ;;  %vm842_vm13 = vcmp.eq.s32.totalorder %v2115_v33, %v820_v47  ;;  %v1127_v47 = vld [vmem:[#allocation10 + $0x10] sm:$0xff] }
 0x4aa   :  { %1158 = vmatpush.msra.mxu3 %v1127_v47 }
 0x4ac   :  { %1159 = vmatpush.msra.mxu3 %v1126_v48  ;;  %v1228_v48 = vld [vmem:[#allocation11 + $0x10] sm:$0xff] }
 0x4ae   :  { %1160 = vmatpush.msra.mxu3 %v1125_v50  ;;  %v1227_v50 = vld [vmem:[#allocation11 + $0x8] sm:$0xff] }
 0x4b1   :  { %1386 = vmatmul.msk.f32.gmra.mxu0 %vm723_vm15, %v1673_v39  ;;  %1402 = vmatmul.msk.f32.gmra.mxu1 %vm835_vm14, %v1673_v39  ;;  %vm843_vm14 = vcmp.eq.s32.totalorder %v2115_v33, %v823_v52  ;;  %vm731_vm15 = vcmp.eq.s32.totalorder %v2115_v33, %v711_v51 }
 0x4b9   :  { %1387 = vmatmul.msk.f32.gmra.mxu0 %vm724_vm0, %v1673_v39  ;;  %1403 = vmatmul.msk.f32.gmra.mxu1 %vm836_vm1, %v1673_v39  ;;  %vm732_vm0 = vcmp.eq.s32.totalorder %v2115_v33, %v714_v53  ;;  %vm844_vm1 = vcmp.eq.s32.totalorder %v2115_v33, %v826_v54 }
 0x4c1   :  { %1388 = vmatmul.msk.f32.gmra.mxu0 %vm725_vm3, %v1673_v39  ;;  %1404 = vmatmul.msk.f32.gmra.mxu1 %vm837_vm2, %v1673_v39  ;;  %vm733_vm2 = vcmp.eq.s32.totalorder %v2115_v33, %v717_v55  ;;  %vm845_vm3 = vcmp.eq.s32.totalorder %v2115_v33, %v829_v56 }
 0x4c9   :  { %1389 = vmatmul.msk.f32.gmra.mxu0 %vm726_vm4, %v1673_v39  ;;  %1405 = vmatmul.msk.f32.gmra.mxu1 %vm838_vm5, %v1673_v39 }
 0x4d1   :  { %1390 = vmatmul.msk.f32.gmra.mxu0 %vm727_vm6, %v1673_v39  ;;  %1406 = vmatmul.msk.f32.gmra.mxu1 %vm839_vm7, %v1673_v39 }
 0x4d9   :  { %1391 = vmatmul.msk.f32.gmra.mxu0 %vm728_vm9, %v1673_v39  ;;  %1407 = vmatmul.msk.f32.gmra.mxu1 %vm840_vm8, %v1673_v39 }
 0x4e1   :  { %1392 = vmatmul.msk.f32.gmra.mxu0 %vm729_vm10, %v1673_v39  ;;  %1408 = vmatmul.msk.f32.gmra.mxu1 %vm841_vm11, %v1673_v39 }
 0x4e9   :  { %1393 = vmatmul.msk.f32.gmra.mxu0 %vm730_vm12, %v1673_v39  ;;  %1409 = vmatmul.msk.f32.gmra.mxu1 %vm842_vm13, %v1673_v39 }
 0x4f1   :  { %1394 = vmatmul.msk.f32.gmra.mxu0 %vm731_vm15, %v1673_v39  ;;  %1410 = vmatmul.msk.f32.gmra.mxu1 %vm843_vm14, %v1673_v39 }
 0x4f9   :  { %1395 = vmatmul.msk.f32.gmra.mxu0 %vm732_vm0, %v1673_v39  ;;  %1411 = vmatmul.msk.f32.gmra.mxu1 %vm844_vm1, %v1673_v39 }
 0x501   :  { %1396 = vmatmul.msk.f32.gmra.mxu0 %vm733_vm2, %v1673_v39  ;;  %1412 = vmatmul.msk.f32.gmra.mxu1 %vm845_vm3, %v1673_v39 }
 0x506   :  { %v895_v57 = vpop.f32.mrf.mxu0  ;;  %v960_v58 = vpop.f32.mrf.mxu1 }
 0x507   :  { %v1008_v60 = vmul.f32 %v960_v58, %v895_v57  ;;  %v2186_v57 = vld [vmem:[%s2228_s12] ss:$0 sm:$0xff] }
 0x509   :  { %1060 = vmatmul.f32.vlgmr.msra.gmra.mxu2 %v1008_v60 }
 0x50e   :  { %v898_v62 = vpop.f32.mrf.mxu0  ;;  %v963_v61 = vpop.f32.mrf.mxu1 }
 0x50f   :  { %v1009_v63 = vmul.f32 %v963_v61, %v898_v62 }
 0x511   :  { %1063 = vmatmul.f32.gmra.mxu2 %v1009_v63 }
 0x516   :  { %v901_v0 = vpop.f32.mrf.mxu0  ;;  %v966_v14 = vpop.f32.mrf.mxu1 }
 0x517   :  { %v1010_v1 = vmul.f32 %v966_v14, %v901_v0 }
 0x519   :  { %1066 = vmatmul.f32.gmra.mxu2 %v1010_v1 }
 0x51e   :  { %v904_v2 = vpop.f32.mrf.mxu0  ;;  %v969_v29 = vpop.f32.mrf.mxu1 }
 0x51f   :  { %v1011_v3 = vmul.f32 %v969_v29, %v904_v2 }
 0x521   :  { %1069 = vmatmul.f32.gmra.mxu2 %v1011_v3 }
 0x526   :  { %v907_v31 = vpop.f32.mrf.mxu0  ;;  %v972_v33 = vpop.f32.mrf.mxu1 }
 0x527   :  { %v1012_v4 = vmul.f32 %v972_v33, %v907_v31 }
 0x529   :  { %1072 = vmatmul.f32.gmra.mxu2 %v1012_v4 }
 0x52e   :  { %v910_v36 = vpop.f32.mrf.mxu0  ;;  %v975_v5 = vpop.f32.mrf.mxu1 }
 0x52f   :  { %v1013_v13 = vmul.f32 %v975_v5, %v910_v36 }
 0x531   :  { %1075 = vmatmul.f32.gmra.mxu2 %v1013_v13 }
 0x536   :  { %v913_v39 = vpop.f32.mrf.mxu0  ;;  %v978_v42 = vpop.f32.mrf.mxu1 }
 0x537   :  { %v1014_v6 = vmul.f32 %v978_v42, %v913_v39 }
 0x539   :  { %1078 = vmatmul.f32.gmra.mxu2 %v1014_v6 }
 0x53e   :  { %v916_v7 = vpop.f32.mrf.mxu0  ;;  %v981_v8 = vpop.f32.mrf.mxu1 }
 0x53f   :  { %v1015_v9 = vmul.f32 %v981_v8, %v916_v7 }
 0x541   :  { %1081 = vmatmul.f32.gmra.mxu2 %v1015_v9 }
 0x546   :  { %v919_v44 = vpop.f32.mrf.mxu0  ;;  %v984_v10 = vpop.f32.mrf.mxu1 }
 0x547   :  { %v1016_v49 = vmul.f32 %v984_v10, %v919_v44 }
 0x549   :  { %1084 = vmatmul.f32.gmra.mxu2 %v1016_v49 }
 0x54e   :  { %v922_v11 = vpop.f32.mrf.mxu0  ;;  %v987_v12 = vpop.f32.mrf.mxu1 }
 0x54f   :  { %v1017_v15 = vmul.f32 %v987_v12, %v922_v11 }
 0x551   :  { %1087 = vmatmul.f32.gmra.mxu2 %v1017_v15 }
 0x556   :  { %v925_v17 = vpop.f32.mrf.mxu0  ;;  %v990_v19 = vpop.f32.mrf.mxu1 }
 0x557   :  { %v1018_v21 = vmul.f32 %v990_v19, %v925_v17 }
 0x559   :  { %1090 = vmatmul.f32.gmra.mxu2 %v1018_v21 }
 0x55e   :  { %v928_v27 = vpop.f32.mrf.mxu0  ;;  %v993_v28 = vpop.f32.mrf.mxu1 }
 0x55f   :  { %v1019_v24 = vmul.f32 %v993_v28, %v928_v27 }
 0x561   :  { %1093 = vmatmul.f32.gmra.mxu2 %v1019_v24 }
 0x566   :  { %v931_v37 = vpop.f32.mrf.mxu0  ;;  %v996_v38 = vpop.f32.mrf.mxu1 }
 0x567   :  { %v1020_v40 = vmul.f32 %v996_v38, %v931_v37  ;;  %v1232_v38 = vld [vmem:[#allocation11 + $0x30] sm:$0xff] }
 0x568   :  { %1255 = vmatpush.msra.mxu0 %v1232_v38 }
 0x569   :  { %1096 = vmatmul.f32.gmra.mxu2 %v1020_v40 }
 0x56a   :  { %1256 = vmatpush.msra.mxu0 %v1231_v41  ;;  %v1480_v41 = vld [vmem:[%s2232_s16] ss:$0 sm:$0xff]  ;;  %s1674_s16 = smov [#allocation13]  }
 0x56b   :  { %s1331_s28 = sshll.u32 %s1674_s16, 4  ;;  %s1332_s28 = int_to_ptr.vmem [resolvable:$true] %s1331_s28 }
 0x56c   :  { %1257 = vmatpush.msra.mxu0 %v1230_v43 }
 0x56e   :  { %v934_v45 = vpop.f32.mrf.mxu0  ;;  %v999_v46 = vpop.f32.mrf.mxu1 }
 0x56f   :  { %v1021_v59 = vmul.f32 %v999_v46, %v934_v45  ;;  %v1229_v45 = vld [vmem:[#allocation11 + $0x18] sm:$0xff] }
 0x570   :  { %1258 = vmatpush.msra.mxu0 %v1229_v45 }
 0x571   :  { %1099 = vmatmul.f32.gmra.mxu2 %v1021_v59 }
 0x572   :  { %1259 = vmatpush.msra.mxu0 %v1228_v48 }
 0x574   :  { %1260 = vmatpush.msra.mxu0 %v1227_v50 }
 0x576   :  { %v937_v51 = vpop.f32.mrf.mxu0  ;;  %v1002_v52 = vpop.f32.mrf.mxu1 }
 0x577   :  { %v1022_v53 = vmul.f32 %v1002_v52, %v937_v51  ;;  %v1226_v51 = vld [vmem:[#allocation11] sm:$0xff] }
 0x578   :  { %1261 = vmatpush.msra.mxu0 %v1226_v51 }
 0x579   :  { %1102 = vmatmul.f32.gmra.mxu2 %v1022_v53 }
 0x57e   :  { %v940_v54 = vpop.f32.mrf.mxu0  ;;  %v1005_v55 = vpop.f32.mrf.mxu1 }
 0x57f   :  { %v1023_v56 = vmul.f32 %v1005_v55, %v940_v54 }
 0x581   :  { %1105 = vmatmul.f32.gmra.mxu2 %v1023_v56 }
 0x58c   :  { %v1061_v58 = vpop.f32.mrf.mxu2 }
 0x58d   :  { %v1062_v60 = vadd.f32 %v2186_v57, %v1061_v58 }
 0x58f   :  { %v1109_v62 = vmax.f32 %v1062_v60, 0.0  ;;  %v1479_v60 = vld [vmem:[%s2230_s14] ss:$0 sm:$0xff] }
 0x591   :  { %1161 = vmatmul.f32.vlgmr.msra.gmra.mxu3 %v1109_v62 }
 0x594   :  { %v1064_v61 = vpop.f32.mrf.mxu2 }
 0x595   :  { %v1065_v63 = vadd.f32 %v2186_v57, %v1064_v61 }
 0x597   :  { %v1110_v0 = vmax.f32 %v1065_v63, 0.0 }
 0x599   :  { %1164 = vmatmul.f32.gmra.mxu3 %v1110_v0 }
 0x59c   :  { %v1067_v14 = vpop.f32.mrf.mxu2 }
 0x59d   :  { %v1068_v1 = vadd.f32 %v2186_v57, %v1067_v14 }
 0x59f   :  { %v1111_v2 = vmax.f32 %v1068_v1, 0.0 }
 0x5a1   :  { %1167 = vmatmul.f32.gmra.mxu3 %v1111_v2 }
 0x5a4   :  { %v1070_v29 = vpop.f32.mrf.mxu2 }
 0x5a5   :  { %v1071_v3 = vadd.f32 %v2186_v57, %v1070_v29 }
 0x5a7   :  { %v1112_v31 = vmax.f32 %v1071_v3, 0.0 }
 0x5a9   :  { %1170 = vmatmul.f32.gmra.mxu3 %v1112_v31 }
 0x5ac   :  { %v1073_v33 = vpop.f32.mrf.mxu2 }
 0x5ad   :  { %v1074_v4 = vadd.f32 %v2186_v57, %v1073_v33 }
 0x5af   :  { %v1113_v36 = vmax.f32 %v1074_v4, 0.0 }
 0x5b1   :  { %1173 = vmatmul.f32.gmra.mxu3 %v1113_v36 }
 0x5b4   :  { %v1076_v5 = vpop.f32.mrf.mxu2 }
 0x5b5   :  { %v1077_v13 = vadd.f32 %v2186_v57, %v1076_v5 }
 0x5b7   :  { %v1114_v39 = vmax.f32 %v1077_v13, 0.0 }
 0x5b9   :  { %1176 = vmatmul.f32.gmra.mxu3 %v1114_v39 }
 0x5bc   :  { %v1079_v42 = vpop.f32.mrf.mxu2 }
 0x5bd   :  { %v1080_v6 = vadd.f32 %v2186_v57, %v1079_v42 }
 0x5bf   :  { %v1115_v7 = vmax.f32 %v1080_v6, 0.0 }
 0x5c1   :  { %1179 = vmatmul.f32.gmra.mxu3 %v1115_v7 }
 0x5c4   :  { %v1082_v8 = vpop.f32.mrf.mxu2 }
 0x5c5   :  { %v1083_v9 = vadd.f32 %v2186_v57, %v1082_v8 }
 0x5c7   :  { %v1116_v44 = vmax.f32 %v1083_v9, 0.0 }
 0x5c9   :  { %1182 = vmatmul.f32.gmra.mxu3 %v1116_v44 }
 0x5cc   :  { %v1085_v10 = vpop.f32.mrf.mxu2 }
 0x5cd   :  { %v1086_v49 = vadd.f32 %v2186_v57, %v1085_v10 }
 0x5cf   :  { %v1117_v11 = vmax.f32 %v1086_v49, 0.0 }
 0x5d1   :  { %1185 = vmatmul.f32.gmra.mxu3 %v1117_v11 }
 0x5d4   :  { %v1088_v12 = vpop.f32.mrf.mxu2 }
 0x5d5   :  { %v1089_v15 = vadd.f32 %v2186_v57, %v1088_v12 }
 0x5d7   :  { %v1118_v16 = vmax.f32 %v1089_v15, 0.0 }
 0x5d9   :  { %1188 = vmatmul.f32.gmra.mxu3 %v1118_v16 }
 0x5dc   :  { %v1091_v17 = vpop.f32.mrf.mxu2 }
 0x5dd   :  { %v1092_v19 = vadd.f32 %v2186_v57, %v1091_v17 }
 0x5df   :  { %v1119_v21 = vmax.f32 %v1092_v19, 0.0 }
 0x5e1   :  { %1191 = vmatmul.f32.gmra.mxu3 %v1119_v21 }
 0x5e4   :  { %v1094_v27 = vpop.f32.mrf.mxu2 }
 0x5e5   :  { %v1095_v28 = vadd.f32 %v2186_v57, %v1094_v27 }
 0x5e7   :  { %v1120_v24 = vmax.f32 %v1095_v28, 0.0 }
 0x5e9   :  { %1194 = vmatmul.f32.gmra.mxu3 %v1120_v24 }
 0x5ec   :  { %v1097_v35 = vpop.f32.mrf.mxu2 }
 0x5ed   :  { %v1098_v37 = vadd.f32 %v2186_v57, %v1097_v35 }
 0x5ef   :  { %v1121_v40 = vmax.f32 %v1098_v37, 0.0 }
 0x5f1   :  { %1197 = vmatmul.f32.gmra.mxu3 %v1121_v40 }
 0x5f4   :  { %v1100_v46 = vpop.f32.mrf.mxu2 }
 0x5f5   :  { %v1101_v59 = vadd.f32 %v2186_v57, %v1100_v46 }
 0x5f7   :  { %v1122_v47 = vmax.f32 %v1101_v59, 0.0 }
 0x5f9   :  { %1200 = vmatmul.f32.gmra.mxu3 %v1122_v47 }
 0x5fc   :  { %v1103_v52 = vpop.f32.mrf.mxu2 }
 0x5fd   :  { %v1104_v53 = vadd.f32 %v2186_v57, %v1103_v52 }
 0x5ff   :  { %v1123_v54 = vmax.f32 %v1104_v53, 0.0 }
 0x601   :  { %1203 = vmatmul.f32.gmra.mxu3 %v1123_v54 }
 0x604   :  { %v1106_v55 = vpop.f32.mrf.mxu2 }
 0x605   :  { %v1107_v56 = vadd.f32 %v2186_v57, %v1106_v55 }
 0x607   :  { %v1124_v58 = vmax.f32 %v1107_v56, 0.0 }
 0x609   :  { %1206 = vmatmul.f32.gmra.mxu3 %v1124_v58 }
 0x614   :  { %v1162_v62 = vpop.f32.mrf.mxu3 }
 0x615   :  { %v1163_v61 = vadd.f32 %v1479_v60, %v1162_v62 }
 0x617   :  { %v1210_v63 = vmax.f32 %v1163_v61, 0.0 }
 0x619   :  { %1262 = vmatmul.f32.vlgmr.msra.gmra.mxu0 %v1210_v63 }
 0x61c   :  { %v1165_v0 = vpop.f32.mrf.mxu3 }
 0x61d   :  { %v1166_v14 = vadd.f32 %v1479_v60, %v1165_v0 }
 0x61f   :  { %v1211_v1 = vmax.f32 %v1166_v14, 0.0 }
 0x621   :  { %1265 = vmatmul.f32.gmra.mxu0 %v1211_v1 }
 0x624   :  { %v1168_v2 = vpop.f32.mrf.mxu3 }
 0x625   :  { %v1169_v29 = vadd.f32 %v1479_v60, %v1168_v2 }
 0x627   :  { %v1212_v3 = vmax.f32 %v1169_v29, 0.0 }
 0x629   :  { %1268 = vmatmul.f32.gmra.mxu0 %v1212_v3 }
 0x62c   :  { %v1171_v31 = vpop.f32.mrf.mxu3 }
 0x62d   :  { %v1172_v57 = vadd.f32 %v1479_v60, %v1171_v31 }
 0x62f   :  { %v1213_v33 = vmax.f32 %v1172_v57, 0.0 }
 0x631   :  { %1271 = vmatmul.f32.gmra.mxu0 %v1213_v33 }
 0x634   :  { %v1174_v4 = vpop.f32.mrf.mxu3 }
 0x635   :  { %v1175_v36 = vadd.f32 %v1479_v60, %v1174_v4 }
 0x637   :  { %v1214_v5 = vmax.f32 %v1175_v36, 0.0 }
 0x639   :  { %1274 = vmatmul.f32.gmra.mxu0 %v1214_v5 }
 0x63c   :  { %v1177_v13 = vpop.f32.mrf.mxu3 }
 0x63d   :  { %v1178_v39 = vadd.f32 %v1479_v60, %v1177_v13 }
 0x63f   :  { %v1215_v42 = vmax.f32 %v1178_v39, 0.0 }
 0x641   :  { %1277 = vmatmul.f32.gmra.mxu0 %v1215_v42 }
 0x644   :  { %v1180_v6 = vpop.f32.mrf.mxu3 }
 0x645   :  { %v1181_v7 = vadd.f32 %v1479_v60, %v1180_v6 }
 0x647   :  { %v1216_v8 = vmax.f32 %v1181_v7, 0.0 }
 0x649   :  { %1280 = vmatmul.f32.gmra.mxu0 %v1216_v8 }
 0x64c   :  { %v1183_v9 = vpop.f32.mrf.mxu3 }
 0x64d   :  { %v1184_v44 = vadd.f32 %v1479_v60, %v1183_v9 }
 0x64f   :  { %v1217_v10 = vmax.f32 %v1184_v44, 0.0 }
 0x651   :  { %1283 = vmatmul.f32.gmra.mxu0 %v1217_v10 }
 0x654   :  { %v1186_v49 = vpop.f32.mrf.mxu3 }
 0x655   :  { %v1187_v11 = vadd.f32 %v1479_v60, %v1186_v49 }
 0x657   :  { %v1218_v12 = vmax.f32 %v1187_v11, 0.0 }
 0x659   :  { %1286 = vmatmul.f32.gmra.mxu0 %v1218_v12 }
 0x65c   :  { %v1189_v15 = vpop.f32.mrf.mxu3 }
 0x65d   :  { %v1190_v16 = vadd.f32 %v1479_v60, %v1189_v15 }
 0x65f   :  { %v1219_v18 = vmax.f32 %v1190_v16, 0.0 }
 0x661   :  { %1289 = vmatmul.f32.gmra.mxu0 %v1219_v18 }
 0x664   :  { %v1192_v17 = vpop.f32.mrf.mxu3 }
 0x665   :  { %v1193_v19 = vadd.f32 %v1479_v60, %v1192_v17 }
 0x667   :  { %v1220_v21 = vmax.f32 %v1193_v19, 0.0 }
 0x669   :  { %1292 = vmatmul.f32.gmra.mxu0 %v1220_v21 }
 0x66c   :  { %v1195_v23 = vpop.f32.mrf.mxu3 }
 0x66d   :  { %v1196_v20 = vadd.f32 %v1479_v60, %v1195_v23 }
 0x66f   :  { %v1221_v25 = vmax.f32 %v1196_v20, 0.0 }
 0x671   :  { %1295 = vmatmul.f32.gmra.mxu0 %v1221_v25 }
 0x674   :  { %v1198_v22 = vpop.f32.mrf.mxu3 }
 0x675   :  { %v1199_v27 = vadd.f32 %v1479_v60, %v1198_v22 }
 0x677   :  { %v1222_v28 = vmax.f32 %v1199_v27, 0.0 }
 0x679   :  { %1298 = vmatmul.f32.gmra.mxu0 %v1222_v28 }
 0x67c   :  { %v1201_v24 = vpop.f32.mrf.mxu3 }
 0x67d   :  { %v1202_v30 = vadd.f32 %v1479_v60, %v1201_v24 }
 0x67f   :  { %v1223_v26 = vmax.f32 %v1202_v30, 0.0 }
 0x681   :  { %1301 = vmatmul.f32.gmra.mxu0 %v1223_v26 }
 0x684   :  { %v1204_v32 = vpop.f32.mrf.mxu3 }
 0x685   :  { %v1205_v34 = vadd.f32 %v1479_v60, %v1204_v32 }
 0x687   :  { %v1224_v35 = vmax.f32 %v1205_v34, 0.0 }
 0x689   :  { %1304 = vmatmul.f32.gmra.mxu0 %v1224_v35 }
 0x68c   :  { %v1207_v37 = vpop.f32.mrf.mxu3 }
 0x68d   :  { %v1208_v38 = vadd.f32 %v1479_v60, %v1207_v37 }
 0x68f   :  { %v1225_v40 = vmax.f32 %v1208_v38, 0.0 }
 0x691   :  { %1307 = vmatmul.f32.gmra.mxu0 %v1225_v40 }
 0x696   :  { %v1263_v43 = vpop.f32.mrf.mxu0 }
 0x697   :  { %v1264_v45 = vadd.f32 %v1480_v41, %v1263_v43 }
 0x699   :  { %1311 = vst [vmem:[#allocation13] sm:$0xff] %v1264_v45 }
 0x69e   :  { %v1266_v46 = vpop.f32.mrf.mxu0 }
 0x69f   :  { %v1267_v59 = vadd.f32 %v1480_v41, %v1266_v46 }
 0x6a1   :  { %1312 = vst [vmem:[#allocation13 + $0x8] sm:$0xff] %v1267_v59 }
 0x6a6   :  { %v1269_v47 = vpop.f32.mrf.mxu0 }
 0x6a7   :  { %v1270_v48 = vadd.f32 %v1480_v41, %v1269_v47 }
 0x6a9   :  { %1313 = vst [vmem:[#allocation13 + $0x10] sm:$0xff] %v1270_v48 }
 0x6ae   :  { %v1272_v50 = vpop.f32.mrf.mxu0 }
 0x6af   :  { %v1273_v51 = vadd.f32 %v1480_v41, %v1272_v50 }
 0x6b1   :  { %1314 = vst [vmem:[#allocation13 + $0x18] sm:$0xff] %v1273_v51 }
 0x6b6   :  { %v1275_v52 = vpop.f32.mrf.mxu0 }
 0x6b7   :  { %v1276_v53 = vadd.f32 %v1480_v41, %v1275_v52 }
 0x6b9   :  { %1315 = vst [vmem:[#allocation13 + $0x20] sm:$0xff] %v1276_v53 }
 0x6be   :  { %v1278_v54 = vpop.f32.mrf.mxu0 }
 0x6bf   :  { %v1279_v55 = vadd.f32 %v1480_v41, %v1278_v54 }
 0x6c1   :  { %1316 = vst [vmem:[#allocation13 + $0x28] sm:$0xff] %v1279_v55 }
 0x6c6   :  { %v1281_v56 = vpop.f32.mrf.mxu0 }
 0x6c7   :  { %v1282_v58 = vadd.f32 %v1480_v41, %v1281_v56 }
 0x6c9   :  { %1317 = vst [vmem:[#allocation13 + $0x30] sm:$0xff] %v1282_v58 }
 0x6ce   :  { %v1284_v60 = vpop.f32.mrf.mxu0 }
 0x6cf   :  { %v1285_v62 = vadd.f32 %v1480_v41, %v1284_v60 }
 0x6d1   :  { %1318 = vst [vmem:[#allocation13 + $0x38] sm:$0xff] %v1285_v62 }
 0x6d6   :  { %v1287_v61 = vpop.f32.mrf.mxu0 }
 0x6d7   :  { %v1288_v63 = vadd.f32 %v1480_v41, %v1287_v61 }
 0x6d9   :  { %1319 = vst [vmem:[#allocation13 + $0x40] sm:$0xff] %v1288_v63 }
 0x6de   :  { %v1290_v0 = vpop.f32.mrf.mxu0 }
 0x6df   :  { %v1291_v14 = vadd.f32 %v1480_v41, %v1290_v0 }
 0x6e1   :  { %1320 = vst [vmem:[#allocation13 + $0x48] sm:$0xff] %v1291_v14 }
 0x6e6   :  { %v1293_v1 = vpop.f32.mrf.mxu0 }
 0x6e7   :  { %v1294_v2 = vadd.f32 %v1480_v41, %v1293_v1 }
 0x6e9   :  { %1321 = vst [vmem:[#allocation13 + $0x50] sm:$0xff] %v1294_v2 }
 0x6ee   :  { %v1296_v29 = vpop.f32.mrf.mxu0 }
 0x6ef   :  { %v1297_v3 = vadd.f32 %v1480_v41, %v1296_v29 }
 0x6f1   :  { %1322 = vst [vmem:[#allocation13 + $0x58] sm:$0xff] %v1297_v3 }
 0x6f6   :  { %v1299_v31 = vpop.f32.mrf.mxu0 }
 0x6f7   :  { %v1300_v57 = vadd.f32 %v1480_v41, %v1299_v31 }
 0x6f9   :  { %1323 = vst [vmem:[#allocation13 + $0x60] sm:$0xff] %v1300_v57 }
 0x6fe   :  { %v1302_v33 = vpop.f32.mrf.mxu0 }
 0x6ff   :  { %v1303_v4 = vadd.f32 %v1480_v41, %v1302_v33 }
 0x701   :  { %1324 = vst [vmem:[#allocation13 + $0x68] sm:$0xff] %v1303_v4 }
 0x706   :  { %v1305_v36 = vpop.f32.mrf.mxu0 }
 0x707   :  { %v1306_v5 = vadd.f32 %v1480_v41, %v1305_v36 }
 0x709   :  { %1325 = vst [vmem:[#allocation13 + $0x70] sm:$0xff] %v1306_v5 }
 0x70e   :  { %v1308_v13 = vpop.f32.mrf.mxu0 }
 0x70f   :  { %v1309_v39 = vadd.f32 %v1480_v41, %v1308_v13 }
 0x711   :  { %1326 = vst [vmem:[#allocation13 + $0x78] sm:$0xff] %v1309_v39 }
 0x712   :  { %1339 = dma.vmem_to_hbm [thread:$0]  %s1332_s28, 2048, %s1334_s6, [#allocation4], %s1664_s18, %s1664_s18, %s1665_s19  }
 0x713   :  { %1661 = dma.done.wait [#allocation4], 2048  }
 0x714   :  { %1662 = vsyncadd [#allocation4], 4294965248 }
 0x715   :  { %1344 = vsyncpa [#allocation3], 1 }
 0x716   :  { %1345 = vsyncpa [#allocation6], 1 }
 0x717   :  { %1346 = vsyncpa [#allocation9], 1 }
 0x718   :  { %1347 = vsyncpa [#allocation12], 1 }
 0x719   :  { %1348 = vsyncpa [#allocation4], 1 }

</bundles_post_ra>
